<compile_context>
chip_gen: v7x
topology: tpu7x:2x2x1
jax: 0.10.0
libtpu: 0.0.40
codegen_flags: <defaults>
</compile_context>

<pallas_src>
import functools
import math

import jax
import jax.numpy as jnp
from jax.experimental import pallas as pl
from jax.experimental.pallas import tpu as pltpu


# --------------------------------------------------------------------------
# helpers
# --------------------------------------------------------------------------
def _round_down(v, m):
    return (v // m) * m


def _round_up(v, m):
    return ((v + m - 1) // m) * m


def _tpu_vmem_bytes():
    # v5e/v6e: 128 MiB, v7x: 64 MiB per TensorCore.
    try:
        return int(getattr(pltpu.get_tpu_info(), "vmem_capacity_bytes", 64 << 20))
    except Exception:
        return 64 << 20


def _pick_row_tile(R, per_row_bytes, fixed_bytes, max_tile=512):
    """Largest row tile that fits the VMEM budget.

    * multiple of 32 rows when possible (dense int8 stores),
    * capped so the row grid has >= 4 steps when R is large enough
      (megacore sharding on v7x + DMA/compute overlap),
    * never larger than the (rounded-up) row count; no host-side padding.
    """
    vmem_cap = _tpu_vmem_bytes()
    budget = max(4 << 20, min(vmem_cap // 3, 24 << 20) - fixed_bytes)
    tr = max(32, _round_down(budget // max(per_row_bytes, 1), 32))
    tr = min(tr, max_tile)
    if R >= 4 * 32:
        tr = min(tr, max(32, _round_down(pl.cdiv(R, 4), 32)))   # >= 4 grid steps
    if R < 8:
        return R                       # block == full dim is always legal
    tr = min(tr, _round_up(R, 8))
    tr = max(8, _round_down(tr, 8))
    return tr


# --------------------------------------------------------------------------
# Kernel 1: fused W8A8B8O8 q/k/v projection + int8 rotary embedding on q/k
# --------------------------------------------------------------------------
def _qkv_rope_kernel(x_ref, wq_ref, wk_ref, wv_ref, bq_ref, bk_ref, bv_ref,
                     cos_ref, sin_ref, q_ref, k_ref, v_ref, *,
                     num_heads, head_dim,
                     alpha_q, alpha_k, alpha_v,
                     q_deq_scale, k_deq_scale, q_req_inv, k_req_inv):
    x = x_ref[...].astype(jnp.float32)           # (tr, D), int8-valued -> exact
    cos = cos_ref[...]                           # (tr, hd//2) f32
    sin = sin_ref[...]
    hd2 = head_dim // 2

    def w8a8b8o8(w_ref, b_ref, alpha):
        # int8 matmul done in f32 on the MXU; exact for int8-valued operands.
        acc = jnp.dot(x, w_ref[...].astype(jnp.float32),
                      preferred_element_type=jnp.float32)
        # bias already pre-folded to f32 (beta * bias_int8) in the wrapper.
        return jnp.clip(jnp.round(alpha * acc + b_ref[...]), -128.0, 127.0)

    def rope_requant(z_q, deq_scale, req_inv):
        # dequant the (already int8-rounded) projection, rotate, requant.
        z = z_q * deq_scale
        pieces = []
        for h in range(num_heads):               # static unroll, lane slices only
            z0 = z[:, h * head_dim: h * head_dim + hd2]
            z1 = z[:, h * head_dim + hd2: (h + 1) * head_dim]
            pieces.append(z0 * cos - z1 * sin)
            pieces.append(z0 * sin + z1 * cos)
        out = jnp.concatenate(pieces, axis=-1)
        return jnp.clip(jnp.round(out * req_inv), -128.0, 127.0).astype(jnp.int8)

    v_ref[...] = w8a8b8o8(wv_ref, bv_ref, alpha_v).astype(jnp.int8)
    q_ref[...] = rope_requant(w8a8b8o8(wq_ref, bq_ref, alpha_q),
                              q_deq_scale, q_req_inv)
    k_ref[...] = rope_requant(w8a8b8o8(wk_ref, bk_ref, alpha_k),
                              k_deq_scale, k_req_inv)


def qkv_rope_int8(x_i8, wq, wk, wv, bq_f32, bk_f32, bv_f32, cos, sin, *,
                  num_heads, alpha_q, alpha_k, alpha_v,
                  q_output_scale, k_output_scale,
                  q_rotary_output_scale, k_rotary_output_scale):
    R, D = x_i8.shape
    head_dim = D // num_heads
    # torch stores weight as [out, in]; transpose once host-side.
    wq_t, wk_t, wv_t = wq.T, wk.T, wv.T

    # VMEM accounting: dbl-buffered int8 x + 3 dbl-buffered int8 outputs +
    # ~4 full-tile f32 temporaries + cos/sin, plus resident weights/biases.
    per_row = D * (2 * 1 + 3 * 2 * 1 + 4 * 4) + (head_dim // 2) * 4 * 4
    fixed = 3 * D * D + 3 * D * 4
    tr = _pick_row_tile(R, per_row, fixed)
    grid = (pl.cdiv(R, tr),)                      # partial last block is masked

    vmem_cap = _tpu_vmem_bytes()
    vmem_limit = int(min(vmem_cap - (4 << 20),
                         max(48 << 20, fixed + per_row * tr + (16 << 20))))

    cost = pl.CostEstimate(
        flops=2 * R * D * D * 3 + 12 * R * D,
        transcendentals=0,
        bytes_accessed=R * D * 4 + 3 * D * D + R * head_dim * 4 + 3 * D * 4,
    )

    row_i8 = pl.BlockSpec((tr, D), lambda i: (i, 0))
    w_spec = pl.BlockSpec((D, D), lambda i: (0, 0))      # resident across the grid
    b_spec = pl.BlockSpec((1, D), lambda i: (0, 0))
    cs_spec = pl.BlockSpec((tr, head_dim // 2), lambda i: (i, 0))

    kernel = functools.partial(
        _qkv_rope_kernel,
        num_heads=num_heads, head_dim=head_dim,
        alpha_q=float(alpha_q), alpha_k=float(alpha_k), alpha_v=float(alpha_v),
        q_deq_scale=float(q_output_scale), k_deq_scale=float(k_output_scale),
        q_req_inv=float(1.0 / q_rotary_output_scale),
        k_req_inv=float(1.0 / k_rotary_output_scale))

    return pl.pallas_call(
        kernel,
        out_shape=tuple(jax.ShapeDtypeStruct((R, D), jnp.int8) for _ in range(3)),
        grid_spec=pltpu.PrefetchScalarGridSpec(
            num_scalar_prefetch=0,
            grid=grid,
            in_specs=[row_i8, w_spec, w_spec, w_spec,
                      b_spec, b_spec, b_spec, cs_spec, cs_spec],
            out_specs=[row_i8, row_i8, row_i8],
        ),
        compiler_params=pltpu.CompilerParams(
            dimension_semantics=("parallel",),
            vmem_limit_bytes=vmem_limit,
        ),
        cost_estimate=cost,
    )(x_i8, wq_t, wk_t, wv_t,
      bq_f32.reshape(1, D), bk_f32.reshape(1, D), bv_f32.reshape(1, D),
      cos, sin)


# --------------------------------------------------------------------------
# Kernel 2: quantized causal context attention (smooth_llama_context_attn_fwd)
# --------------------------------------------------------------------------
def _ctx_attn_kernel(q_ref, k_ref, v_ref, o_ref, *,
                     qk_scale, v_scale, inv_out_scale):
    q = q_ref[0].astype(jnp.float32)             # (S, hd)
    k = k_ref[0].astype(jnp.float32)
    v = v_ref[0].astype(jnp.float32)

    s = jnp.dot(q, k.T, preferred_element_type=jnp.float32) * qk_scale   # (S, S)
    S = s.shape[0]
    row = jax.lax.broadcasted_iota(jnp.int32, (S, S), 0)
    col = jax.lax.broadcasted_iota(jnp.int32, (S, S), 1)
    s = jnp.where(col <= row, s, -1e30)          # causal mask

    m = jnp.max(s, axis=-1, keepdims=True)
    p = jnp.exp(s - m)
    l = jnp.sum(p, axis=-1, keepdims=True)
    o = jnp.dot(p, v, preferred_element_type=jnp.float32) * (v_scale / l)
    o_ref[0] = jnp.clip(jnp.round(o * inv_out_scale), -128.0, 127.0).astype(jnp.int8)


def int8_context_attention(q_i8, k_i8, v_i8, *, batch, seq_len, num_heads,
                           q_scale, k_scale, v_scale, out_input_scale):
    R, D = q_i8.shape
    hd = D // num_heads

    def to_bh(x):   # [R, D] -> [B*H, S, hd] (wrapper-side layout plumbing)
        return (x.reshape(batch, seq_len, num_heads, hd)
                 .transpose(0, 2, 1, 3)
                 .reshape(batch * num_heads, seq_len, hd))

    qb, kb, vb = to_bh(q_i8), to_bh(k_i8), to_bh(v_i8)
    BH = batch * num_heads
    blk = pl.BlockSpec((1, seq_len, hd), lambda i: (i, 0, 0))

    kernel = functools.partial(
        _ctx_attn_kernel,
        qk_scale=float(q_scale * k_scale / math.sqrt(hd)),
        v_scale=float(v_scale),
        inv_out_scale=float(1.0 / out_input_scale))

    out = pl.pallas_call(
        kernel,
        out_shape=jax.ShapeDtypeStruct((BH, seq_len, hd), jnp.int8),
        grid_spec=pltpu.PrefetchScalarGridSpec(
            num_scalar_prefetch=0, grid=(BH,),
            in_specs=[blk, blk, blk], out_specs=blk),
        compiler_params=pltpu.CompilerParams(
            dimension_semantics=("parallel",)),
    )(qb, kb, vb)

    return (out.reshape(batch, num_heads, seq_len, hd)
               .transpose(0, 2, 1, 3)
               .reshape(R, D))


# --------------------------------------------------------------------------
# Kernel 3: W8A8BFP32OFP32 output projection (o_proj)
# --------------------------------------------------------------------------
def _o_proj_kernel(x_ref, w_ref, b_ref, o_ref, *, alpha):
    x = x_ref[...].astype(jnp.float32)
    acc = jnp.dot(x, w_ref[...].astype(jnp.float32),
                  preferred_element_type=jnp.float32)
    o_ref[...] = alpha * acc + b_ref[...]


def w8a8bfp32_o_proj(x_i8, w, b_f32, *, alpha):
    R, D = x_i8.shape
    w_t = w.T
    per_row = D * (2 * 1 + 2 * 4 + 3 * 4)
    fixed = D * D + D * 4
    tr = _pick_row_tile(R, per_row, fixed)
    grid = (pl.cdiv(R, tr),)

    vmem_cap = _tpu_vmem_bytes()
    vmem_limit = int(min(vmem_cap - (4 << 20),
                         max(48 << 20, fixed + per_row * tr + (16 << 20))))

    cost = pl.CostEstimate(flops=2 * R * D * D, transcendentals=0,
                           bytes_accessed=R * D * 5 + D * D + D * 4)

    return pl.pallas_call(
        functools.partial(_o_proj_kernel, alpha=float(alpha)),
        out_shape=jax.ShapeDtypeStruct((R, D), jnp.float32),
        grid_spec=pltpu.PrefetchScalarGridSpec(
            num_scalar_prefetch=0, grid=grid,
            in_specs=[pl.BlockSpec((tr, D), lambda i: (i, 0)),
                      pl.BlockSpec((D, D), lambda i: (0, 0)),
                      pl.BlockSpec((1, D), lambda i: (0, 0))],
            out_specs=pl.BlockSpec((tr, D), lambda i: (i, 0))),
        compiler_params=pltpu.CompilerParams(
            dimension_semantics=("parallel",), vmem_limit_bytes=vmem_limit),
        cost_estimate=cost,
    )(x_i8, w_t, b_f32.reshape(1, D))


# --------------------------------------------------------------------------
# Top-level forward (context / prefill stage of LLamaSmoothquantAttention)
# --------------------------------------------------------------------------
def llama_smoothquant_attention_prefill(
        hidden_states_i8, cos, sin, *, num_heads,
        wq, wk, wv, wo, bq_f32, bk_f32, bv_f32, bo_f32,
        alpha_q, alpha_k, alpha_v,
        q_output_scale, k_output_scale,
        q_rotary_output_scale, k_rotary_output_scale,
        v_output_scale, out_input_scale, o_alpha):
    B, S, D = hidden_states_i8.shape
    x = hidden_states_i8.reshape(B * S, D)
    q, k, v = qkv_rope_int8(
        x, wq, wk, wv, bq_f32, bk_f32, bv_f32, cos, sin,
        num_heads=num_heads, alpha_q=alpha_q, alpha_k=alpha_k, alpha_v=alpha_v,
        q_output_scale=q_output_scale, k_output_scale=k_output_scale,
        q_rotary_output_scale=q_rotary_output_scale,
        k_rotary_output_scale=k_rotary_output_scale)
    attn_i8 = int8_context_attention(
        q, k, v, batch=B, seq_len=S, num_heads=num_heads,
        q_scale=q_rotary_output_scale, k_scale=k_rotary_output_scale,
        v_scale=v_output_scale, out_input_scale=out_input_scale)
    out = w8a8bfp32_o_proj(attn_i8, wo, bo_f32, alpha=o_alpha)
    return out.reshape(B, S, D)


# --------------------------------------------------------------------------
# Pure-JAX references (mirror the kernel math op-for-op)
# --------------------------------------------------------------------------
def _ref_w8a8b8o8(x_i8, w_oi, b_f32, alpha):
    acc = jnp.dot(x_i8.astype(jnp.float32), w_oi.astype(jnp.float32).T)
    return jnp.clip(jnp.round(alpha * acc + b_f32[None, :]), -128.0, 127.0)


def _ref_rope_requant(z_q, cos, sin, deq_scale, req_inv, H, hd):
    R = z_q.shape[0]
    z = (z_q * deq_scale).reshape(R, H, hd)
    z0, z1 = z[..., : hd // 2], z[..., hd // 2:]
    c, s = cos[:, None, :], sin[:, None, :]
    o = jnp.concatenate([z0 * c - z1 * s, z0 * s + z1 * c], axis=-1)
    o = o.reshape(R, H * hd)
    return jnp.clip(jnp.round(o * req_inv), -128.0, 127.0).astype(jnp.int8)


def _ref_ctx_attn(q_i8, k_i8, v_i8, B, S, H, hd, qk_scale, v_scale, inv_out_scale):
    def to_bh(x):
        return (x.reshape(B, S, H, hd).transpose(0, 2, 1, 3)
                 .reshape(B * H, S, hd).astype(jnp.float32))
    q, k, v = to_bh(q_i8), to_bh(k_i8), to_bh(v_i8)
    s = jnp.einsum("bqd,bkd->bqk", q, k) * qk_scale
    row = jnp.arange(S)[:, None]
    col = jnp.arange(S)[None, :]
    s = jnp.where(col <= row, s, -1e30)
    m = jnp.max(s, axis=-1, keepdims=True)
    p = jnp.exp(s - m)
    l = jnp.sum(p, axis=-1, keepdims=True)
    o = jnp.einsum("bqk,bkd->bqd", p, v) * (v_scale / l)
    o = jnp.clip(jnp.round(o * inv_out_scale), -128.0, 127.0).astype(jnp.int8)
    return o.reshape(B, H, S, hd).transpose(0, 2, 1, 3).reshape(B * S, H * hd)


def _ref_o_proj(x_i8, w_oi, b_f32, alpha):
    acc = jnp.dot(x_i8.astype(jnp.float32), w_oi.astype(jnp.float32).T)
    return alpha * acc + b_f32[None, :]


def _max_int_diff(a, b):
    return int(jnp.max(jnp.abs(a.astype(jnp.int32) - b.astype(jnp.int32))))


# --------------------------------------------------------------------------
# main
# --------------------------------------------------------------------------
if __name__ == "__main__":
    key = jax.random.PRNGKey(0)
    ks = jax.random.split(key, 10)

    # Small shapes consistent with the module: hidden=128, heads=4, head_dim=32.
    B, S, H, hd = 2, 16, 4, 32
    D = H * hd
    R = B * S

    def rint8(k, shape):
        return jax.random.randint(k, shape, -127, 128, dtype=jnp.int32).astype(jnp.int8)

    x_i8 = rint8(ks[0], (B, S, D))                  # hidden_states (already int8)
    wq, wk, wv, wo = (rint8(ks[i], (D, D)) for i in range(1, 5))
    bq = jax.random.normal(ks[5], (D,), jnp.float32) * 2.0   # = beta * bias_int8
    bk = jax.random.normal(ks[6], (D,), jnp.float32) * 2.0
    bv = jax.random.normal(ks[7], (D,), jnp.float32) * 2.0
    bo = jax.random.normal(ks[8], (D,), jnp.float32) * 0.5

    # rotary tables, one row per token (row order = (batch, seq))
    pos = jnp.arange(S, dtype=jnp.float32)
    inv_freq = 1.0 / (10000.0 ** (jnp.arange(0, hd, 2, dtype=jnp.float32) / hd))
    ang = pos[:, None] * inv_freq[None, :]
    cos = jnp.tile(jnp.cos(ang), (B, 1))            # (R, hd//2)
    sin = jnp.tile(jnp.sin(ang), (B, 1))

    sc = dict(alpha_q=7e-4, alpha_k=7e-4, alpha_v=7e-4,
              q_output_scale=0.03, k_output_scale=0.03,
              q_rotary_output_scale=0.03, k_rotary_output_scale=0.03,
              v_output_scale=0.03, out_input_scale=0.04, o_alpha=5e-4)

    x2 = x_i8.reshape(R, D)

    # --- stage 1: fused QKV + rope ---------------------------------------
    q_i8, k_i8, v_i8 = jax.block_until_ready(qkv_rope_int8(
        x2, wq, wk, wv, bq, bk, bv, cos, sin,
        num_heads=H, alpha_q=sc["alpha_q"], alpha_k=sc["alpha_k"],
        alpha_v=sc["alpha_v"],
        q_output_scale=sc["q_output_scale"], k_output_scale=sc["k_output_scale"],
        q_rotary_output_scale=sc["q_rotary_output_scale"],
        k_rotary_output_scale=sc["k_rotary_output_scale"]))

    q_ref = _ref_rope_requant(_ref_w8a8b8o8(x2, wq, bq, sc["alpha_q"]), cos, sin,
                              sc["q_output_scale"],
                              1.0 / sc["q_rotary_output_scale"], H, hd)
    k_ref = _ref_rope_requant(_ref_w8a8b8o8(x2, wk, bk, sc["alpha_k"]), cos, sin,
                              sc["k_output_scale"],
                              1.0 / sc["k_rotary_output_scale"], H, hd)
    v_ref = _ref_w8a8b8o8(x2, wv, bv, sc["alpha_v"]).astype(jnp.int8)
    assert _max_int_diff(q_i8, q_ref) <= 1
    assert _max_int_diff(k_i8, k_ref) <= 1
    assert _max_int_diff(v_i8, v_ref) <= 1

    # --- stage 2: quantized causal context attention ----------------------
    attn_i8 = jax.block_until_ready(int8_context_attention(
        q_i8, k_i8, v_i8, batch=B, seq_len=S, num_heads=H,
        q_scale=sc["q_rotary_output_scale"], k_scale=sc["k_rotary_output_scale"],
        v_scale=sc["v_output_scale"], out_input_scale=sc["out_input_scale"]))
    attn_ref = _ref_ctx_attn(
        q_i8, k_i8, v_i8, B, S, H, hd,
        sc["q_rotary_output_scale"] * sc["k_rotary_output_scale"] / math.sqrt(hd),
        sc["v_output_scale"], 1.0 / sc["out_input_scale"])
    assert _max_int_diff(attn_i8, attn_ref) <= 1

    # --- stage 3: o_proj ---------------------------------------------------
    out = jax.block_until_ready(w8a8bfp32_o_proj(attn_i8, wo, bo, alpha=sc["o_alpha"]))
    out_ref = _ref_o_proj(attn_i8, wo, bo, sc["o_alpha"])
    assert bool(jnp.allclose(out, out_ref, rtol=1e-4, atol=1e-2))

    # --- full fused forward ------------------------------------------------
    full = jax.block_until_ready(llama_smoothquant_attention_prefill(
        x_i8, cos, sin, num_heads=H,
        wq=wq, wk=wk, wv=wv, wo=wo,
        bq_f32=bq, bk_f32=bk, bv_f32=bv, bo_f32=bo, **sc))
    assert full.shape == (B, S, D) and full.dtype == jnp.float32
    assert bool(jnp.all(jnp.isfinite(full)))

    print("KERNEL_OK")
</pallas_src>

<mosaic_0001>
module attributes {stable_mosaic.version = 11 : i64} {
  func.func @_qkv_rope_kernel(%arg0: i32, %arg1: memref<32x128xi8, #tpu.memory_space<vmem>>, %arg2: memref<128x128xi8, #tpu.memory_space<vmem>>, %arg3: memref<128x128xi8, #tpu.memory_space<vmem>>, %arg4: memref<128x128xi8, #tpu.memory_space<vmem>>, %arg5: memref<1x128xf32, #tpu.memory_space<vmem>>, %arg6: memref<1x128xf32, #tpu.memory_space<vmem>>, %arg7: memref<1x128xf32, #tpu.memory_space<vmem>>, %arg8: memref<32x16xf32, #tpu.memory_space<vmem>>, %arg9: memref<32x16xf32, #tpu.memory_space<vmem>>, %arg10: memref<32x128xi8, #tpu.memory_space<vmem>>, %arg11: memref<32x128xi8, #tpu.memory_space<vmem>>, %arg12: memref<32x128xi8, #tpu.memory_space<vmem>>) attributes {dimension_semantics = [#tpu.dimension_semantics<parallel>], iteration_bounds = array<i64: 1>, scalar_prefetch = 0 : i64, scratch_operands = 0 : i64, tpu.core_type = #tpu.core_type<tc>, window_params = [{transform_indices = @transform_0, window_bounds = array<i64: 32, 128>}, {pipeline_mode = #tpu.pipeline_mode<synchronous>, transform_indices = @transform_1, window_bounds = array<i64: 128, 128>}, {pipeline_mode = #tpu.pipeline_mode<synchronous>, transform_indices = @transform_2, window_bounds = array<i64: 128, 128>}, {pipeline_mode = #tpu.pipeline_mode<synchronous>, transform_indices = @transform_3, window_bounds = array<i64: 128, 128>}, {pipeline_mode = #tpu.pipeline_mode<synchronous>, transform_indices = @transform_4, window_bounds = array<i64: 1, 128>}, {pipeline_mode = #tpu.pipeline_mode<synchronous>, transform_indices = @transform_5, window_bounds = array<i64: 1, 128>}, {pipeline_mode = #tpu.pipeline_mode<synchronous>, transform_indices = @transform_6, window_bounds = array<i64: 1, 128>}, {transform_indices = @transform_7, window_bounds = array<i64: 32, 16>}, {transform_indices = @transform_8, window_bounds = array<i64: 32, 16>}, {transform_indices = @transform_9, window_bounds = array<i64: 32, 128>}, {transform_indices = @transform_10, window_bounds = array<i64: 32, 128>}, {transform_indices = @transform_11, window_bounds = array<i64: 32, 128>}]} {
    %c0 = arith.constant 0 : index
    %c0_0 = arith.constant 0 : index
    %0 = vector.load %arg1[%c0, %c0_0] : memref<32x128xi8, #tpu.memory_space<vmem>>, vector<32x128xi8>
    %1 = arith.sitofp %0 : vector<32x128xi8> to vector<32x128xf32>
    %c0_1 = arith.constant 0 : index
    %c0_2 = arith.constant 0 : index
    %2 = vector.load %arg8[%c0_1, %c0_2] : memref<32x16xf32, #tpu.memory_space<vmem>>, vector<32x16xf32>
    %c0_3 = arith.constant 0 : index
    %c0_4 = arith.constant 0 : index
    %3 = vector.load %arg9[%c0_3, %c0_4] : memref<32x16xf32, #tpu.memory_space<vmem>>, vector<32x16xf32>
    %c0_5 = arith.constant 0 : index
    %c0_6 = arith.constant 0 : index
    %4 = vector.load %arg4[%c0_5, %c0_6] : memref<128x128xi8, #tpu.memory_space<vmem>>, vector<128x128xi8>
    %5 = arith.sitofp %4 : vector<128x128xi8> to vector<128x128xf32>
    %cst = arith.constant dense<0.000000e+00> : vector<32x128xf32>
    %6 = tpu.matmul %1, %5, %cst {dimension_numbers = #tpu.dot_dimension_numbers<[1], [0], [0], [1], [0, 0, 1, 1], [], []>} : vector<32x128xf32>, vector<128x128xf32>, vector<32x128xf32> -> vector<32x128xf32>
    %cst_7 = arith.constant 7.000000e-04 : f32
    %7 = vector.broadcast %cst_7 : f32 to vector<32x128xf32>
    %8 = arith.mulf %7, %6 : vector<32x128xf32>
    %c0_8 = arith.constant 0 : index
    %c0_9 = arith.constant 0 : index
    %9 = vector.load %arg7[%c0_8, %c0_9] : memref<1x128xf32, #tpu.memory_space<vmem>>, vector<1x128xf32>
    %10 = vector.broadcast %9 : vector<1x128xf32> to vector<32x128xf32>
    %11 = arith.addf %8, %10 : vector<32x128xf32>
    %12 = math.roundeven %11 : vector<32x128xf32>
    %cst_10 = arith.constant -1.280000e+02 : f32
    %cst_11 = arith.constant 1.270000e+02 : f32
    %13 = vector.broadcast %cst_10 : f32 to vector<32x128xf32>
    %14 = arith.maximumf %13, %12 : vector<32x128xf32>
    %15 = vector.broadcast %cst_11 : f32 to vector<32x128xf32>
    %16 = arith.minimumf %15, %14 : vector<32x128xf32>
    %17 = arith.fptosi %16 : vector<32x128xf32> to vector<32x128xi8>
    %c0_12 = arith.constant 0 : index
    %c0_13 = arith.constant 0 : index
    %18 = vector.load %arg12[%c0_12, %c0_13] : memref<32x128xi8, #tpu.memory_space<vmem>>, vector<32x128xi8>
    tpu.vector_store %arg12[%c0_12, %c0_13], %17 {strides = array<i32>} : memref<32x128xi8, #tpu.memory_space<vmem>>, vector<32x128xi8>,
    %c0_14 = arith.constant 0 : index
    %c0_15 = arith.constant 0 : index
    %19 = vector.load %arg2[%c0_14, %c0_15] : memref<128x128xi8, #tpu.memory_space<vmem>>, vector<128x128xi8>
    %20 = arith.sitofp %19 : vector<128x128xi8> to vector<128x128xf32>
    %cst_16 = arith.constant dense<0.000000e+00> : vector<32x128xf32>
    %21 = tpu.matmul %1, %20, %cst_16 {dimension_numbers = #tpu.dot_dimension_numbers<[1], [0], [0], [1], [0, 0, 1, 1], [], []>} : vector<32x128xf32>, vector<128x128xf32>, vector<32x128xf32> -> vector<32x128xf32>
    %cst_17 = arith.constant 7.000000e-04 : f32
    %22 = vector.broadcast %cst_17 : f32 to vector<32x128xf32>
    %23 = arith.mulf %22, %21 : vector<32x128xf32>
    %c0_18 = arith.constant 0 : index
    %c0_19 = arith.constant 0 : index
    %24 = vector.load %arg5[%c0_18, %c0_19] : memref<1x128xf32, #tpu.memory_space<vmem>>, vector<1x128xf32>
    %25 = vector.broadcast %24 : vector<1x128xf32> to vector<32x128xf32>
    %26 = arith.addf %23, %25 : vector<32x128xf32>
    %27 = math.roundeven %26 : vector<32x128xf32>
    %cst_20 = arith.constant -1.280000e+02 : f32
    %cst_21 = arith.constant 1.270000e+02 : f32
    %28 = vector.broadcast %cst_20 : f32 to vector<32x128xf32>
    %29 = arith.maximumf %28, %27 : vector<32x128xf32>
    %30 = vector.broadcast %cst_21 : f32 to vector<32x128xf32>
    %31 = arith.minimumf %30, %29 : vector<32x128xf32>
    %cst_22 = arith.constant 3.000000e-02 : f32
    %32 = vector.broadcast %cst_22 : f32 to vector<32x128xf32>
    %33 = arith.mulf %31, %32 : vector<32x128xf32>
    %34 = vector.extract_strided_slice %33 {offsets = [0, 0], sizes = [32, 16], strides = [1, 1]} : vector<32x128xf32> to vector<32x16xf32>
    %35 = vector.extract_strided_slice %33 {offsets = [0, 16], sizes = [32, 16], strides = [1, 1]} : vector<32x128xf32> to vector<32x16xf32>
    %36 = arith.mulf %34, %2 : vector<32x16xf32>
    %37 = arith.mulf %35, %3 : vector<32x16xf32>
    %38 = arith.subf %36, %37 : vector<32x16xf32>
    %39 = arith.mulf %34, %3 : vector<32x16xf32>
    %40 = arith.mulf %35, %2 : vector<32x16xf32>
    %41 = arith.addf %39, %40 : vector<32x16xf32>
    %42 = vector.extract_strided_slice %33 {offsets = [0, 32], sizes = [32, 16], strides = [1, 1]} : vector<32x128xf32> to vector<32x16xf32>
    %43 = vector.extract_strided_slice %33 {offsets = [0, 48], sizes = [32, 16], strides = [1, 1]} : vector<32x128xf32> to vector<32x16xf32>
    %44 = arith.mulf %42, %2 : vector<32x16xf32>
    %45 = arith.mulf %43, %3 : vector<32x16xf32>
    %46 = arith.subf %44, %45 : vector<32x16xf32>
    %47 = arith.mulf %42, %3 : vector<32x16xf32>
    %48 = arith.mulf %43, %2 : vector<32x16xf32>
    %49 = arith.addf %47, %48 : vector<32x16xf32>
    %50 = vector.extract_strided_slice %33 {offsets = [0, 64], sizes = [32, 16], strides = [1, 1]} : vector<32x128xf32> to vector<32x16xf32>
    %51 = vector.extract_strided_slice %33 {offsets = [0, 80], sizes = [32, 16], strides = [1, 1]} : vector<32x128xf32> to vector<32x16xf32>
    %52 = arith.mulf %50, %2 : vector<32x16xf32>
    %53 = arith.mulf %51, %3 : vector<32x16xf32>
    %54 = arith.subf %52, %53 : vector<32x16xf32>
    %55 = arith.mulf %50, %3 : vector<32x16xf32>
    %56 = arith.mulf %51, %2 : vector<32x16xf32>
    %57 = arith.addf %55, %56 : vector<32x16xf32>
    %58 = vector.extract_strided_slice %33 {offsets = [0, 96], sizes = [32, 16], strides = [1, 1]} : vector<32x128xf32> to vector<32x16xf32>
    %59 = vector.extract_strided_slice %33 {offsets = [0, 112], sizes = [32, 16], strides = [1, 1]} : vector<32x128xf32> to vector<32x16xf32>
    %60 = arith.mulf %58, %2 : vector<32x16xf32>
    %61 = arith.mulf %59, %3 : vector<32x16xf32>
    %62 = arith.subf %60, %61 : vector<32x16xf32>
    %63 = arith.mulf %58, %3 : vector<32x16xf32>
    %64 = arith.mulf %59, %2 : vector<32x16xf32>
    %65 = arith.addf %63, %64 : vector<32x16xf32>
    %66 = tpu.concatenate %38, %41, %46, %49, %54, %57, %62, %65 in 1 : vector<32x16xf32>, vector<32x16xf32>, vector<32x16xf32>, vector<32x16xf32>, vector<32x16xf32>, vector<32x16xf32>, vector<32x16xf32>, vector<32x16xf32> -> vector<32x128xf32>
    %cst_23 = arith.constant 33.3333321 : f32
    %67 = vector.broadcast %cst_23 : f32 to vector<32x128xf32>
    %68 = arith.mulf %66, %67 : vector<32x128xf32>
    %69 = math.roundeven %68 : vector<32x128xf32>
    %cst_24 = arith.constant -1.280000e+02 : f32
    %cst_25 = arith.constant 1.270000e+02 : f32
    %70 = vector.broadcast %cst_24 : f32 to vector<32x128xf32>
    %71 = arith.maximumf %70, %69 : vector<32x128xf32>
    %72 = vector.broadcast %cst_25 : f32 to vector<32x128xf32>
    %73 = arith.minimumf %72, %71 : vector<32x128xf32>
    %74 = arith.fptosi %73 : vector<32x128xf32> to vector<32x128xi8>
    %c0_26 = arith.constant 0 : index
    %c0_27 = arith.constant 0 : index
    %75 = vector.load %arg10[%c0_26, %c0_27] : memref<32x128xi8, #tpu.memory_space<vmem>>, vector<32x128xi8>
    tpu.vector_store %arg10[%c0_26, %c0_27], %74 {strides = array<i32>} : memref<32x128xi8, #tpu.memory_space<vmem>>, vector<32x128xi8>,
    %c0_28 = arith.constant 0 : index
    %c0_29 = arith.constant 0 : index
    %76 = vector.load %arg3[%c0_28, %c0_29] : memref<128x128xi8, #tpu.memory_space<vmem>>, vector<128x128xi8>
    %77 = arith.sitofp %76 : vector<128x128xi8> to vector<128x128xf32>
    %cst_30 = arith.constant dense<0.000000e+00> : vector<32x128xf32>
    %78 = tpu.matmul %1, %77, %cst_30 {dimension_numbers = #tpu.dot_dimension_numbers<[1], [0], [0], [1], [0, 0, 1, 1], [], []>} : vector<32x128xf32>, vector<128x128xf32>, vector<32x128xf32> -> vector<32x128xf32>
    %cst_31 = arith.constant 7.000000e-04 : f32
    %79 = vector.broadcast %cst_31 : f32 to vector<32x128xf32>
    %80 = arith.mulf %79, %78 : vector<32x128xf32>
    %c0_32 = arith.constant 0 : index
    %c0_33 = arith.constant 0 : index
    %81 = vector.load %arg6[%c0_32, %c0_33] : memref<1x128xf32, #tpu.memory_space<vmem>>, vector<1x128xf32>
    %82 = vector.broadcast %81 : vector<1x128xf32> to vector<32x128xf32>
    %83 = arith.addf %80, %82 : vector<32x128xf32>
    %84 = math.roundeven %83 : vector<32x128xf32>
    %cst_34 = arith.constant -1.280000e+02 : f32
    %cst_35 = arith.constant 1.270000e+02 : f32
    %85 = vector.broadcast %cst_34 : f32 to vector<32x128xf32>
    %86 = arith.maximumf %85, %84 : vector<32x128xf32>
    %87 = vector.broadcast %cst_35 : f32 to vector<32x128xf32>
    %88 = arith.minimumf %87, %86 : vector<32x128xf32>
    %cst_36 = arith.constant 3.000000e-02 : f32
    %89 = vector.broadcast %cst_36 : f32 to vector<32x128xf32>
    %90 = arith.mulf %88, %89 : vector<32x128xf32>
    %91 = vector.extract_strided_slice %90 {offsets = [0, 0], sizes = [32, 16], strides = [1, 1]} : vector<32x128xf32> to vector<32x16xf32>
    %92 = vector.extract_strided_slice %90 {offsets = [0, 16], sizes = [32, 16], strides = [1, 1]} : vector<32x128xf32> to vector<32x16xf32>
    %93 = arith.mulf %91, %2 : vector<32x16xf32>
    %94 = arith.mulf %92, %3 : vector<32x16xf32>
    %95 = arith.subf %93, %94 : vector<32x16xf32>
    %96 = arith.mulf %91, %3 : vector<32x16xf32>
    %97 = arith.mulf %92, %2 : vector<32x16xf32>
    %98 = arith.addf %96, %97 : vector<32x16xf32>
    %99 = vector.extract_strided_slice %90 {offsets = [0, 32], sizes = [32, 16], strides = [1, 1]} : vector<32x128xf32> to vector<32x16xf32>
    %100 = vector.extract_strided_slice %90 {offsets = [0, 48], sizes = [32, 16], strides = [1, 1]} : vector<32x128xf32> to vector<32x16xf32>
    %101 = arith.mulf %99, %2 : vector<32x16xf32>
    %102 = arith.mulf %100, %3 : vector<32x16xf32>
    %103 = arith.subf %101, %102 : vector<32x16xf32>
    %104 = arith.mulf %99, %3 : vector<32x16xf32>
    %105 = arith.mulf %100, %2 : vector<32x16xf32>
    %106 = arith.addf %104, %105 : vector<32x16xf32>
    %107 = vector.extract_strided_slice %90 {offsets = [0, 64], sizes = [32, 16], strides = [1, 1]} : vector<32x128xf32> to vector<32x16xf32>
    %108 = vector.extract_strided_slice %90 {offsets = [0, 80], sizes = [32, 16], strides = [1, 1]} : vector<32x128xf32> to vector<32x16xf32>
    %109 = arith.mulf %107, %2 : vector<32x16xf32>
    %110 = arith.mulf %108, %3 : vector<32x16xf32>
    %111 = arith.subf %109, %110 : vector<32x16xf32>
    %112 = arith.mulf %107, %3 : vector<32x16xf32>
    %113 = arith.mulf %108, %2 : vector<32x16xf32>
    %114 = arith.addf %112, %113 : vector<32x16xf32>
    %115 = vector.extract_strided_slice %90 {offsets = [0, 96], sizes = [32, 16], strides = [1, 1]} : vector<32x128xf32> to vector<32x16xf32>
    %116 = vector.extract_strided_slice %90 {offsets = [0, 112], sizes = [32, 16], strides = [1, 1]} : vector<32x128xf32> to vector<32x16xf32>
    %117 = arith.mulf %115, %2 : vector<32x16xf32>
    %118 = arith.mulf %116, %3 : vector<32x16xf32>
    %119 = arith.subf %117, %118 : vector<32x16xf32>
    %120 = arith.mulf %115, %3 : vector<32x16xf32>
    %121 = arith.mulf %116, %2 : vector<32x16xf32>
    %122 = arith.addf %120, %121 : vector<32x16xf32>
    %123 = tpu.concatenate %95, %98, %103, %106, %111, %114, %119, %122 in 1 : vector<32x16xf32>, vector<32x16xf32>, vector<32x16xf32>, vector<32x16xf32>, vector<32x16xf32>, vector<32x16xf32>, vector<32x16xf32>, vector<32x16xf32> -> vector<32x128xf32>
    %cst_37 = arith.constant 33.3333321 : f32
    %124 = vector.broadcast %cst_37 : f32 to vector<32x128xf32>
    %125 = arith.mulf %123, %124 : vector<32x128xf32>
    %126 = math.roundeven %125 : vector<32x128xf32>
    %cst_38 = arith.constant -1.280000e+02 : f32
    %cst_39 = arith.constant 1.270000e+02 : f32
    %127 = vector.broadcast %cst_38 : f32 to vector<32x128xf32>
    %128 = arith.maximumf %127, %126 : vector<32x128xf32>
    %129 = vector.broadcast %cst_39 : f32 to vector<32x128xf32>
    %130 = arith.minimumf %129, %128 : vector<32x128xf32>
    %131 = arith.fptosi %130 : vector<32x128xf32> to vector<32x128xi8>
    %c0_40 = arith.constant 0 : index
    %c0_41 = arith.constant 0 : index
    %132 = vector.load %arg11[%c0_40, %c0_41] : memref<32x128xi8, #tpu.memory_space<vmem>>, vector<32x128xi8>
    tpu.vector_store %arg11[%c0_40, %c0_41], %131 {strides = array<i32>} : memref<32x128xi8, #tpu.memory_space<vmem>>, vector<32x128xi8>,
    return
  }
  func.func @transform_0(%arg0: i32) -> (i32, i32) {
    %c0_i32 = arith.constant 0 : i32
    %c0_i32_0 = arith.constant 0 : i32
    return %arg0, %c0_i32 : i32, i32
  }
  func.func @transform_1(%arg0: i32) -> (i32, i32) {
    %c0_i32 = arith.constant 0 : i32
    %c0_i32_0 = arith.constant 0 : i32
    %c0_i32_1 = arith.constant 0 : i32
    return %c0_i32, %c0_i32_0 : i32, i32
  }
  func.func @transform_2(%arg0: i32) -> (i32, i32) {
    %c0_i32 = arith.constant 0 : i32
    %c0_i32_0 = arith.constant 0 : i32
    %c0_i32_1 = arith.constant 0 : i32
    return %c0_i32, %c0_i32_0 : i32, i32
  }
  func.func @transform_3(%arg0: i32) -> (i32, i32) {
    %c0_i32 = arith.constant 0 : i32
    %c0_i32_0 = arith.constant 0 : i32
    %c0_i32_1 = arith.constant 0 : i32
    return %c0_i32, %c0_i32_0 : i32, i32
  }
  func.func @transform_4(%arg0: i32) -> (i32, i32) {
    %c0_i32 = arith.constant 0 : i32
    %c0_i32_0 = arith.constant 0 : i32
    %c0_i32_1 = arith.constant 0 : i32
    return %c0_i32, %c0_i32_0 : i32, i32
  }
  func.func @transform_5(%arg0: i32) -> (i32, i32) {
    %c0_i32 = arith.constant 0 : i32
    %c0_i32_0 = arith.constant 0 : i32
    %c0_i32_1 = arith.constant 0 : i32
    return %c0_i32, %c0_i32_0 : i32, i32
  }
  func.func @transform_6(%arg0: i32) -> (i32, i32) {
    %c0_i32 = arith.constant 0 : i32
    %c0_i32_0 = arith.constant 0 : i32
    %c0_i32_1 = arith.constant 0 : i32
    return %c0_i32, %c0_i32_0 : i32, i32
  }
  func.func @transform_7(%arg0: i32) -> (i32, i32) {
    %c0_i32 = arith.constant 0 : i32
    %c0_i32_0 = arith.constant 0 : i32
    return %arg0, %c0_i32 : i32, i32
  }
  func.func @transform_8(%arg0: i32) -> (i32, i32) {
    %c0_i32 = arith.constant 0 : i32
    %c0_i32_0 = arith.constant 0 : i32
    return %arg0, %c0_i32 : i32, i32
  }
  func.func @transform_9(%arg0: i32) -> (i32, i32) {
    %c0_i32 = arith.constant 0 : i32
    %c0_i32_0 = arith.constant 0 : i32
    return %arg0, %c0_i32 : i32, i32
  }
  func.func @transform_10(%arg0: i32) -> (i32, i32) {
    %c0_i32 = arith.constant 0 : i32
    %c0_i32_0 = arith.constant 0 : i32
    return %arg0, %c0_i32 : i32, i32
  }
  func.func @transform_11(%arg0: i32) -> (i32, i32) {
    %c0_i32 = arith.constant 0 : i32
    %c0_i32_0 = arith.constant 0 : i32
    return %arg0, %c0_i32 : i32, i32
  }
}

</mosaic_0001>

<bundles_post_ra>
// kernel: tpu_custom_call.1
= control target key start
LH: loop header
LB: loop body
LE: loop exit
PB: predicated region body
PF: predicated region fallthrough
CT: control target
= control target key end

     0   :  { %17 = vsyncpa [#allocation3], 0  ;;  %s3039_s0 = inlined_call_operand.hbm [shape: s8[32,128], index: 0, kind: input, shape index: {}]   ;;  %s3040_s1 = inlined_call_operand.vmem [shape: s8[128,128], index: 1, kind: input, shape index: {}]   ;;  %s3041_s2 = inlined_call_operand.vmem [shape: s8[128,128], index: 2, kind: input, shape index: {}]   ;;  %s3042_s3 = inlined_call_operand.vmem [shape: s8[128,128], index: 3, kind: input, shape index: {}]   ;;  %s3043_s4 = inlined_call_operand.vmem [shape: f32[1,128], index: 4, kind: input, shape index: {}]   ;;  %s3044_s5 = inlined_call_operand.vmem [shape: f32[1,128], index: 5, kind: input, shape index: {}]   ;;  %s3045_s6 = inlined_call_operand.vmem [shape: f32[1,128], index: 6, kind: input, shape index: {}]   ;;  %s3046_s7 = inlined_call_operand.vmem [shape: f32[32,16], index: 7, kind: input, shape index: {}]   ;;  %s3047_s8 = inlined_call_operand.vmem [shape: f32[32,16], index: 8, kind: input, shape index: {}]   ;;  %s3048_s9 = inlined_call_operand.hbm [shape: s8[32,128], index: 9, kind: output, shape index: {0}]   ;;  %s3049_s10 = inlined_call_operand.hbm [shape: s8[32,128], index: 10, kind: output, shape index: {1}]   ;;  %s3050_s11 = inlined_call_operand.hbm [shape: s8[32,128], index: 11, kind: output, shape index: {2}]  }
   0x1   :  { %18 = vsyncpa [#allocation4], 0 }
   0x2   :  { %19 = vsyncpa [#allocation7], 0  ;;  %s1874_s17 = smov [#allocation2]   ;;  %s1780_s21 = scalar_lea.hbm %s3039_s0, 128 }
   0x3   :  { %s26_s18 = sshll.u32 %s1874_s17, 4  ;;  %p1781_p0 = scmp.ne.s32.totalorder %s3039_s0, %s1780_s21  ;;  %s27_s18 = int_to_ptr.vmem [resolvable:$true] %s26_s18 }
   0x4   :  { %p1784_p1 = scmp.lt.u32.totalorder %s1780_s21, %s3039_s0 }
   0x6   :  { %p1786_p2 = pnand %p1784_p1, %p1781_p0 }
   0x8   :  { %1789 = shalt.err (!%p1786_p2)
}
   0x9   :  { %s1790_s26 = scalar_lea.vmem %s27_s18, 128  ;;  %p1795_p4 = scmp.lt.s32.totalorder %s27_s18, %s27_s18 }
   0xa   :  { %p1791_p3 = scmp.ne.s32.totalorder %s27_s18, %s1790_s26  ;;  %p1796_p5 = scmp.lt.s32.totalorder %s1790_s26, %s1790_s26 }
   0xc   :  { %p1797_p6 = por %p1796_p5, %p1795_p4 }
   0xe   :  { %p1798_p7 = pnand %p1797_p6, %p1791_p3 }
  0x10   :  { %1801 = shalt.err (!%p1798_p7)
}
  0x11   :  { %29 = dma.hbm_to_vmem [thread:$0]  %s3039_s0, 128, %s27_s18, [#allocation3]  }
  0x12   :  { %1868 = dma.done.wait [#allocation3], 128  }
  0x13   :  { %1869 = vsyncadd [#allocation3], 4294967168  ;;  %v66_v0 = vld [vmem:[%s3042_s3] sm:$0xff]  ;;  %v67_v6 = vld [vmem:[%s3042_s3 + $0x8] sm:$0xff]  ;;  %s1875_s21 = smov 16   ;;  %s1876_s23 = smov 32  }
  0x14   :  { %v229_v1 = vld [vmem:[%s3040_s1] sm:$0xff]  ;;  %v1629_v2 = vunpack.c.l.s8.bf16 %v66_v0  ;;  %v1633_v3 = vunpack.c.h.s8.bf16 %v66_v0  ;;  %v230_v7 = vld [vmem:[%s3040_s1 + $0x8] sm:$0xff]  ;;  %v1974_v9 = vld [vmem:[%s3047_s8 + $0x10] sm:$0xff]  ;;  %v1637_v11 = vunpack.c.l.s8.bf16 %v67_v6  ;;  %v1641_v17 = vunpack.c.h.s8.bf16 %v67_v6  ;;  %s1877_s24 = smov 48   ;;  %s1879_s12 = smov 80  }
  0x15   :  { %v1661_v4 = vunpack.c.l.s8.bf16 %v229_v1  ;;  %v1665_v5 = vunpack.c.h.s8.bf16 %v229_v1  ;;  %v1969_v8 = vld [vmem:[#allocation2] sm:$0xff]  ;;  %v1669_v12 = vunpack.c.l.s8.bf16 %v230_v7  ;;  %393 = vrot.lane.b32.xlu1 %v1974_v9, %s1875_s21  ;;  %v1991_v15 = vld [vmem:[%s3047_s8 + $0x18] sm:$0xff]  ;;  %v1996_v16 = vld [vmem:[%s3047_s8 + $0x8] sm:$0xff]  ;;  %v1673_v18 = vunpack.c.h.s8.bf16 %v230_v7  ;;  %s1880_s13 = smov 112   ;;  %s1881_s14 = smov 96  }
  0x16   :  { %1630 = vmatprep.subr.bf16.mxu0 %v1629_v2  ;;  %v1979_v10 = vld [vmem:[%s3047_s8] sm:$0xff]  ;;  %v50_v13 = vunpack.c.0.s8 %v1969_v8  ;;  %3076 = vst [vmem:[#allocation12_spill] sm:$0xff] %v1991_v15  ;;  %v68_v19 = vld [vmem:[%s3042_s3 + $0x10] sm:$0xff]  ;;  %v2013_v21 = vld [vmem:[%s3046_s7 + $0x8] sm:$0xff]  ;;  %v51_v36 = vunpack.c.1.s8 %v1969_v8  ;;  %v52_v38 = vunpack.c.2.s8 %v1969_v8  ;;  %v53_v40 = vunpack.c.3.s8 %v1969_v8 }
  0x17   :  { %1662 = vmatprep.subr.bf16.mxu1 %v1661_v4  ;;  %1632 = vmatpush3.bf16.msra.mxu0 %v1629_v2  ;;  %v231_v20 = vld [vmem:[%s3040_s1 + $0x10] sm:$0xff]  ;;  %v2018_v22 = vld [vmem:[%s3046_s7] sm:$0xff]  ;;  %v1645_v23 = vunpack.c.l.s8.bf16 %v68_v19  ;;  %v2027_v25 = vld [vmem:[%s3046_s7 + $0x18] sm:$0xff]  ;;  %v1649_v27 = vunpack.c.h.s8.bf16 %v68_v19  ;;  %vm845_vm0 = vcmask 130048   ;;  %vm850_vm1 = vcmask 261120  }
  0x18   :  { %1664 = vmatpush3.bf16.msra.mxu1 %v1661_v4  ;;  %1634 = vmatprep.subr.bf16.mxu0 %v1633_v3  ;;  %v1986_v14 = vcvt.s32.f32 %v50_v13  ;;  %v1677_v24 = vunpack.c.l.s8.bf16 %v231_v20  ;;  %3077 = vst [vmem:[#allocation13_spill] sm:$0xff] %v2027_v25  ;;  %v2032_v26 = vld [vmem:[%s3046_s7 + $0x10] sm:$0xff]  ;;  %v1681_v28 = vunpack.c.h.s8.bf16 %v231_v20  ;;  %v69_v29 = vld [vmem:[%s3042_s3 + $0x18] sm:$0xff]  ;;  %v911_v35 = vld [vmem:[%s3041_s2] sm:$0xff]  ;;  %v2057_v39 = vcvt.s32.f32 %v51_v36 }
  0x19   :  { %1666 = vmatprep.subr.bf16.mxu1 %v1665_v5  ;;  %389 = vrot.lane.b32.xlu0 %v1979_v10, %s1875_s21  ;;  %3078 = vst [vmem:[#allocation14_spill] sm:$0xff] %v2032_v26  ;;  %v232_v30 = vld [vmem:[%s3040_s1 + $0x18] sm:$0xff]  ;;  %v1653_v31 = vunpack.c.l.s8.bf16 %v69_v29  ;;  %v1657_v33 = vunpack.c.h.s8.bf16 %v69_v29  ;;  %v1693_v37 = vunpack.c.l.s8.bf16 %v911_v35  ;;  %v56_v41 = vcvt.s32.f32 %v52_v38  ;;  %v912_v43 = vld [vmem:[%s3041_s2 + $0x8] sm:$0xff]  ;;  %v913_v47 = vld [vmem:[%s3041_s2 + $0x10] sm:$0xff] }
  0x1a   :  { %1585 = vmatprep.mubr.f32.mxu1 %v1986_v14  ;;  %1547 = vmatprep.mubr.f32.mxu0 %v1986_v14  ;;  %v1685_v32 = vunpack.c.l.s8.bf16 %v232_v30  ;;  %v1689_v34 = vunpack.c.h.s8.bf16 %v232_v30  ;;  %v1697_v42 = vunpack.c.h.s8.bf16 %v911_v35  ;;  %v57_v44 = vcvt.s32.f32 %v53_v40  ;;  %v914_v50 = vld [vmem:[%s3041_s2 + $0x18] sm:$0xff]  ;;  %s1878_s2 = smov 64   ;;  %v2216_v35 = vld [vmem:[%s3043_s4] ss:$0 sm:$0xff] }
  0x1b   :  { %1636 = vmatpush3.bf16.msra.mxu0 %v1633_v3  ;;  %395 = vrot.lane.b32.xlu1 %v1991_v15, %s1875_s21  ;;  %v1701_v45 = vunpack.c.l.s8.bf16 %v912_v43  ;;  %v1705_v46 = vunpack.c.h.s8.bf16 %v912_v43  ;;  %v1709_v48 = vunpack.c.l.s8.bf16 %v913_v47  ;;  %v1713_v49 = vunpack.c.h.s8.bf16 %v913_v47 }
  0x1c   :  { %1668 = vmatpush3.bf16.msra.mxu1 %v1665_v5  ;;  %1638 = vmatprep.subr.bf16.mxu0 %v1637_v11  ;;  %v1717_v51 = vunpack.c.l.s8.bf16 %v914_v50  ;;  %v1721_v52 = vunpack.c.h.s8.bf16 %v914_v50  ;;  %vm855_vm2 = vcmask 392192   ;;  %vm860_vm3 = vcmask 523264  }
  0x1d   :  { %1670 = vmatprep.subr.bf16.mxu1 %v1669_v12  ;;  %391 = vrot.lane.b32.xlu0 %v1996_v16, %s1875_s21  ;;  %vm865_vm4 = vcmask 654336   ;;  %vm870_vm5 = vcmask 785408   ;;  %vm875_vm6 = vcmask 916480  }
  0x1f   :  { %1640 = vmatpush3.bf16.msra.mxu0 %v1637_v11  ;;  %435 = vrot.lane.b32.xlu1 %v2013_v21, %s1875_s21 }
  0x20   :  { %1672 = vmatpush3.bf16.msra.mxu1 %v1669_v12  ;;  %1642 = vmatprep.subr.bf16.mxu0 %v1641_v17 }
  0x21   :  { %1674 = vmatprep.subr.bf16.mxu1 %v1673_v18  ;;  %433 = vrot.lane.b32.xlu0 %v2018_v22, %s1875_s21 }
  0x23   :  { %1644 = vmatpush3.bf16.msra.mxu0 %v1641_v17  ;;  %439 = vrot.lane.b32.xlu1 %v2027_v25, %s1875_s21 }
  0x24   :  { %1676 = vmatpush3.bf16.msra.mxu1 %v1673_v18  ;;  %1646 = vmatprep.subr.bf16.mxu0 %v1645_v23 }
  0x25   :  { %1678 = vmatprep.subr.bf16.mxu1 %v1677_v24  ;;  %437 = vrot.lane.b32.xlu0 %v2032_v26, %s1875_s21 }
  0x27   :  { %1648 = vmatpush3.bf16.msra.mxu0 %v1645_v23  ;;  %471 = vrot.lane.b32.xlu1 %v2013_v21, %s1876_s23 }
  0x28   :  { %1680 = vmatpush3.bf16.msra.mxu1 %v1677_v24  ;;  %1650 = vmatprep.subr.bf16.mxu0 %v1649_v27 }
  0x29   :  { %1682 = vmatprep.subr.bf16.mxu1 %v1681_v28  ;;  %469 = vrot.lane.b32.xlu0 %v2018_v22, %s1876_s23 }
  0x2b   :  { %1652 = vmatpush3.bf16.msra.mxu0 %v1649_v27  ;;  %475 = vrot.lane.b32.xlu1 %v2027_v25, %s1876_s23 }
  0x2c   :  { %1684 = vmatpush3.bf16.msra.mxu1 %v1681_v28  ;;  %1654 = vmatprep.subr.bf16.mxu0 %v1653_v31 }
  0x2d   :  { %1686 = vmatprep.subr.bf16.mxu1 %v1685_v32  ;;  %473 = vrot.lane.b32.xlu0 %v2032_v26, %s1876_s23 }
  0x2f   :  { %1656 = vmatpush3.bf16.msra.mxu0 %v1653_v31  ;;  %487 = vrot.lane.b32.xlu1 %v1996_v16, %s1877_s24 }
  0x30   :  { %1688 = vmatpush3.bf16.msra.mxu1 %v1685_v32  ;;  %1658 = vmatprep.subr.bf16.mxu0 %v1657_v33 }
  0x31   :  { %1690 = vmatprep.subr.bf16.mxu1 %v1689_v34  ;;  %485 = vrot.lane.b32.xlu0 %v1979_v10, %s1877_s24 }
  0x33   :  { %1660 = vmatpush3.bf16.msra.mxu0 %v1657_v33  ;;  %491 = vrot.lane.b32.xlu1 %v1991_v15, %s1877_s24 }
  0x34   :  { %1692 = vmatpush3.bf16.msra.mxu1 %v1689_v34  ;;  %1694 = vmatprep.subr.bf16.mxu0 %v1693_v37 }
  0x35   :  { %1725 = vmatprep.subr.bf16.mxu1 %v1693_v37  ;;  %489 = vrot.lane.b32.xlu0 %v1974_v9, %s1877_s24 }
  0x36   :  { %1548 = vmatmul.mubr.f32.vlgmr.msra.gmra.mrb[0].mxu0 %v2057_v39 }
  0x37   :  { %1586 = vmatmul.mubr.f32.vlgmr.msra.gmra.mrb[0].mxu1 %v2057_v39  ;;  %1696 = vmatpush3.bf16.msra.mxu0 %v1693_v37 }
  0x38   :  { %1733 = vmatpush3.bf16.msra.mxu1 %v1693_v37  ;;  %1588 = vmatprep.mubr.f32.mxu1 %v56_v41  ;;  %v1452_v37 = vld [vmem:[%s3045_s6] ss:$0 sm:$0xff] }
  0x39   :  { %1698 = vmatprep.subr.bf16.mxu0 %v1697_v42  ;;  %1726 = vmatprep.subr.bf16.mxu1 %v1697_v42 }
  0x3a   :  { %1550 = vmatprep.mubr.f32.mxu0 %v56_v41  ;;  %523 = vrot.lane.b32.xlu1 %v1996_v16, %s1876_s23 }
  0x3b   :  { %1589 = vmatmul.mubr.f32.gmra.mrb[2].mxu1 %v57_v44  ;;  %1551 = vmatmul.mubr.f32.gmra.mrb[2].mxu0 %v57_v44 }
  0x3c   :  { %1700 = vmatpush3.bf16.msra.mxu0 %v1697_v42  ;;  %1734 = vmatpush3.bf16.msra.mxu1 %v1697_v42 }
  0x3d   :  { %1702 = vmatprep.subr.bf16.mxu0 %v1701_v45  ;;  %1727 = vmatprep.subr.bf16.mxu1 %v1701_v45 }
  0x3e   :  { %1623 = vmatprep.mubr.f32.mxu0 %v1986_v14  ;;  %1626 = vmatprep.mubr.f32.mxu1 %v56_v41 }
  0x3f   :  { %521 = vrot.lane.b32.xlu0 %v1979_v10, %s1876_s23  ;;  %527 = vrot.lane.b32.xlu1 %v1991_v15, %s1876_s23 }
  0x40   :  { %1704 = vmatpush3.bf16.msra.mxu0 %v1701_v45  ;;  %1735 = vmatpush3.bf16.msra.mxu1 %v1701_v45 }
  0x41   :  { %1706 = vmatprep.subr.bf16.mxu0 %v1705_v46  ;;  %1728 = vmatprep.subr.bf16.mxu1 %v1705_v46 }
  0x43   :  { %525 = vrot.lane.b32.xlu0 %v1974_v9, %s1876_s23  ;;  %539 = vrot.lane.b32.xlu1 %v2013_v21, %s1877_s24 }
  0x44   :  { %1708 = vmatpush3.bf16.msra.mxu0 %v1705_v46  ;;  %1736 = vmatpush3.bf16.msra.mxu1 %v1705_v46 }
  0x45   :  { %1710 = vmatprep.subr.bf16.mxu0 %v1709_v48  ;;  %1729 = vmatprep.subr.bf16.mxu1 %v1709_v48 }
  0x47   :  { %537 = vrot.lane.b32.xlu0 %v2018_v22, %s1877_s24  ;;  %543 = vrot.lane.b32.xlu1 %v2027_v25, %s1877_s24 }
  0x48   :  { %1712 = vmatpush3.bf16.msra.mxu0 %v1709_v48  ;;  %1737 = vmatpush3.bf16.msra.mxu1 %v1709_v48 }
  0x49   :  { %1714 = vmatprep.subr.bf16.mxu0 %v1713_v49  ;;  %1730 = vmatprep.subr.bf16.mxu1 %v1713_v49 }
  0x4b   :  { %541 = vrot.lane.b32.xlu0 %v2032_v26, %s1877_s24  ;;  %575 = vrot.lane.b32.xlu1 %v2013_v21, %s1878_s2 }
  0x4c   :  { %1716 = vmatpush3.bf16.msra.mxu0 %v1713_v49  ;;  %1738 = vmatpush3.bf16.msra.mxu1 %v1713_v49 }
  0x4d   :  { %1718 = vmatprep.subr.bf16.mxu0 %v1717_v51  ;;  %1731 = vmatprep.subr.bf16.mxu1 %v1717_v51 }
  0x4f   :  { %573 = vrot.lane.b32.xlu0 %v2018_v22, %s1878_s2  ;;  %579 = vrot.lane.b32.xlu1 %v2027_v25, %s1878_s2 }
  0x50   :  { %1720 = vmatpush3.bf16.msra.mxu0 %v1717_v51  ;;  %1739 = vmatpush3.bf16.msra.mxu1 %v1717_v51 }
  0x51   :  { %1722 = vmatprep.subr.bf16.mxu0 %v1721_v52  ;;  %1732 = vmatprep.subr.bf16.mxu1 %v1721_v52 }
  0x53   :  { %577 = vrot.lane.b32.xlu0 %v2032_v26, %s1878_s2  ;;  %591 = vrot.lane.b32.xlu1 %v1996_v16, %s1879_s12 }
  0x54   :  { %1724 = vmatpush3.bf16.msra.mxu0 %v1721_v52  ;;  %1740 = vmatpush3.bf16.msra.mxu1 %v1721_v52 }
  0x57   :  { %1624 = vmatmul.mubr.f32.vlgmr.msra.gmra.mrb[4].mxu0 %v2057_v39  ;;  %1627 = vmatmul.mubr.f32.vlgmr.msra.gmra.mrb[4].mxu1 %v57_v44 }
  0x58   :  { %589 = vrot.lane.b32.xlu0 %v1979_v10, %s1879_s12  ;;  %595 = vrot.lane.b32.xlu1 %v1991_v15, %s1879_s12 }
  0x5c   :  { %593 = vrot.lane.b32.xlu0 %v1974_v9, %s1879_s12  ;;  %627 = vrot.lane.b32.xlu1 %v1996_v16, %s1878_s2 }
  0x60   :  { %625 = vrot.lane.b32.xlu0 %v1979_v10, %s1878_s2  ;;  %643 = vrot.lane.b32.xlu1 %v2013_v21, %s1879_s12 }
  0x64   :  { %641 = vrot.lane.b32.xlu0 %v2018_v22, %s1879_s12  ;;  %647 = vrot.lane.b32.xlu1 %v2027_v25, %s1879_s12 }
  0x68   :  { %645 = vrot.lane.b32.xlu0 %v2032_v26, %s1879_s12  ;;  %747 = vrot.lane.b32.xlu1 %v2013_v21, %s1880_s13 }
  0x6c   :  { %745 = vrot.lane.b32.xlu0 %v2018_v22, %s1880_s13  ;;  %751 = vrot.lane.b32.xlu1 %v2027_v25, %s1880_s13 }
  0x70   :  { %749 = vrot.lane.b32.xlu0 %v2032_v26, %s1880_s13  ;;  %631 = vrot.lane.b32.xlu1 %v1991_v15, %s1878_s2 }
  0x74   :  { %629 = vrot.lane.b32.xlu0 %v1974_v9, %s1878_s2  ;;  %679 = vrot.lane.b32.xlu1 %v2013_v21, %s1881_s14  ;;  %s1883_s2 = smov [#allocation8]  }
  0x75   :  { %s1436_s12 = sshll.u32 %s1883_s2, 4  ;;  %s2989_s12 = int_to_ptr.vmem [resolvable:$true] %s1436_s12 }
  0x78   :  { %677 = vrot.lane.b32.xlu0 %v2018_v22, %s1881_s14  ;;  %683 = vrot.lane.b32.xlu1 %v2027_v25, %s1881_s14 }
  0x7c   :  { %681 = vrot.lane.b32.xlu0 %v2032_v26, %s1881_s14  ;;  %695 = vrot.lane.b32.xlu1 %v1996_v16, %s1880_s13 }
  0x80   :  { %693 = vrot.lane.b32.xlu0 %v1979_v10, %s1880_s13  ;;  %699 = vrot.lane.b32.xlu1 %v1991_v15, %s1880_s13 }
  0x84   :  { %697 = vrot.lane.b32.xlu0 %v1974_v9, %s1880_s13  ;;  %731 = vrot.lane.b32.xlu1 %v1996_v16, %s1881_s14 }
  0x87   :  { %v2137_v53 = vpop.permute.xlu1 %393 }
  0x88   :  { %729 = vrot.lane.b32.xlu0 %v1979_v10, %s1881_s14  ;;  %735 = vrot.lane.b32.xlu1 %v1991_v15, %s1881_s14 }
  0x8b   :  { %v2139_v54 = vpop.permute.xlu0 %389 }
  0x8c   :  { %733 = vrot.lane.b32.xlu0 %v1974_v9, %s1881_s14 }
  0x8d   :  { %v2141_v55 = vpop.permute.xlu1 %395 }
  0x8f   :  { %v2143_v56 = vpop.permute.xlu0 %391 }
  0x91   :  { %v2145_v57 = vpop.permute.xlu1 %435 }
  0x93   :  { %v2147_v58 = vpop.permute.xlu0 %433 }
  0x95   :  { %v2149_v59 = vpop.permute.xlu1 %439 }
  0x97   :  { %v2151_v60 = vpop.permute.xlu0 %437 }
  0x99   :  { %v2153_v61 = vpop.permute.xlu1 %471 }
  0x9b   :  { %v2155_v62 = vpop.permute.xlu0 %469 }
  0x9d   :  { %v2157_v63 = vpop.permute.xlu1 %475 }
  0x9e   :  { %3079 = vst [vmem:[#allocation15_spill] sm:$0xff] %v2157_v63 }
  0x9f   :  { %v2159_v0 = vpop.permute.xlu0 %473 }
  0xa0   :  { %3080 = vst [vmem:[#allocation16_spill] sm:$0xff] %v2159_v0 }
  0xa1   :  { %v2161_v1 = vpop.permute.xlu1 %487 }
  0xa3   :  { %v2163_v2 = vpop.permute.xlu0 %485 }
  0xa5   :  { %v2165_v3 = vpop.permute.xlu1 %491 }
  0xa7   :  { %v2167_v4 = vpop.permute.xlu0 %489 }
  0xac   :  { %v2169_v5 = vpop.permute.xlu1 %523 }
  0xb1   :  { %v2171_v6 = vpop.permute.xlu0 %521  ;;  %v2173_v7 = vpop.permute.xlu1 %527 }
  0xb2   :  { %3081 = vst [vmem:[#allocation17_spill] sm:$0xff] %v2173_v7 }
  0xb5   :  { %v2175_v8 = vpop.permute.xlu0 %525  ;;  %v2177_v9 = vpop.permute.xlu1 %539 }
  0xb6   :  { %3082 = vst [vmem:[#allocation18_spill] sm:$0xff] %v2175_v8 }
  0xb9   :  { %v2179_v11 = vpop.permute.xlu0 %537  ;;  %v2181_v12 = vpop.permute.xlu1 %543 }
  0xbd   :  { %v2183_v13 = vpop.permute.xlu0 %541  ;;  %v2185_v14 = vpop.permute.xlu1 %575 }
  0xc1   :  { %v2187_v17 = vpop.permute.xlu0 %573  ;;  %v2189_v18 = vpop.permute.xlu1 %579 }
  0xc2   :  { %3083 = vst [vmem:[#allocation19_spill] sm:$0xff] %v2187_v17  ;;  %3084 = vst [vmem:[#allocation20_spill] sm:$0xff] %v2189_v18 }
  0xc5   :  { %v2191_v19 = vpop.permute.xlu0 %577  ;;  %v2193_v20 = vpop.permute.xlu1 %591 }
  0xc6   :  { %3085 = vst [vmem:[#allocation21_spill] sm:$0xff] %v2191_v19 }
  0xca   :  { %v2195_v23 = vpop.permute.xlu0 %589  ;;  %v2197_v24 = vpop.permute.xlu1 %595 }
  0xce   :  { %v2199_v27 = vpop.permute.xlu0 %593  ;;  %v2201_v28 = vpop.permute.xlu1 %627 }
  0xd2   :  { %v2203_v29 = vpop.permute.xlu0 %625  ;;  %v2205_v30 = vpop.permute.xlu1 %643 }
  0xd3   :  { %3086 = vst [vmem:[#allocation22_spill] sm:$0xff] %v2203_v29 }
  0xd6   :  { %v2207_v31 = vpop.permute.xlu0 %641  ;;  %v2209_v32 = vpop.permute.xlu1 %647 }
  0xda   :  { %v2211_v33 = vpop.permute.xlu0 %645  ;;  %v2223_v8 = vpop.permute.xlu1 %747 }
  0xde   :  { %v2229_v29 = vpop.permute.xlu1 %751 }
 0x109   :  { %v1549_v36 = vpop.f32.mrb[0].mxu0 }
 0x10a   :  { %v1587_v34 = vpop.f32.mrb[0].mxu1  ;;  %v188_v40 = vmul.f32 0.0007, %v1549_v36  ;;  %v168_v41 = vpop.f32.mrb[1].mxu0 }
 0x10b   :  { %v351_v38 = vmul.f32 0.0007, %v1587_v34  ;;  %v331_v39 = vpop.f32.mrb[1].mxu1  ;;  %v187_v43 = vmul.f32 0.0007, %v168_v41 }
 0x10c   :  { %v350_v42 = vmul.f32 0.0007, %v331_v39  ;;  %v199_v45 = vadd.f32 %v1452_v37, %v188_v40  ;;  %v2225_v39 = vpop.permute.xlu0 %745 }
 0x10d   :  { %v362_v44 = vadd.f32 %v2216_v35, %v351_v38  ;;  %v198_v48 = vadd.f32 %v1452_v37, %v187_v43 }
 0x10e   :  { %v361_v46 = vadd.f32 %v2216_v35, %v350_v42  ;;  %v1590_v47 = vpop.f32.mrb[2].mxu1  ;;  %v1552_v49 = vpop.f32.mrb[2].mxu0  ;;  %v1742_v52 = vround.rtne.f32 %v199_v45 }
 0x10f   :  { %v1746_v50 = vround.rtne.f32 %v362_v44  ;;  %v341_v51 = vpop.f32.mrb[3].mxu1  ;;  %v190_v19 = vmul.f32 0.0007, %v1552_v49  ;;  %v178_v18 = vpop.f32.mrb[3].mxu0  ;;  %v1741_v36 = vround.rtne.f32 %v198_v48 }
 0x110   :  { %v1745_v34 = vround.rtne.f32 %v361_v46  ;;  %v189_v7 = vmul.f32 0.0007, %v178_v18  ;;  %v207_v38 = vmax.f32 %v1742_v52, -128.0  ;;  %v2233_v52 = vpop.permute.xlu0 %749 }
 0x111   :  { %v370_v41 = vmax.f32 %v1746_v50, -128.0  ;;  %v201_v40 = vadd.f32 %v1452_v37, %v190_v19  ;;  %v206_v42 = vmax.f32 %v1741_v36, -128.0 }
 0x112   :  { %v369_v0 = vmax.f32 %v1745_v34, -128.0  ;;  %v200_v63 = vadd.f32 %v1452_v37, %v189_v7  ;;  %v211_v15 = vmin.f32 %v207_v38, 127.0  ;;  %v2243_v34 = vpop.permute.xlu1 %631 }
 0x113   :  { %v374_v43 = vmin.f32 %v370_v41, 127.0  ;;  %v1744_v44 = vround.rtne.f32 %v201_v40  ;;  %v210_v45 = vmin.f32 %v206_v42, 127.0  ;;  %v353_v42 = vmul.f32 0.0007, %v1590_v47 }
 0x114   :  { %v373_v26 = vmin.f32 %v369_v0, 127.0  ;;  %v1743_v49 = vround.rtne.f32 %v200_v63  ;;  %v215_v18 = vtrunc.f32 %v211_v15  ;;  %v2247_v38 = vpop.permute.xlu0 %629 }
 0x115   :  { %v2227_v25 = vmul.f32 0.03, %v374_v43  ;;  %v214_v48 = vtrunc.f32 %v210_v45  ;;  %v209_v50 = vmax.f32 %v1744_v44, -128.0  ;;  %v352_v45 = vmul.f32 0.0007, %v341_v51 }
 0x116   :  { %v2231_v46 = vmul.f32 0.03, %v373_v26  ;;  %v208_v19 = vmax.f32 %v1743_v49, -128.0 }
 0x117   :  { %v402_v7 = vmul.f32 %v2143_v56, %v2227_v25  ;;  %v218_v63 = vpack.c.f32.eXmY %v214_v48, %v215_v18, 312  ;;  %v213_v37 = vmin.f32 %v209_v50, 127.0  ;;  %v446_v15 = vmul.f32 %v2145_v57, %v2227_v25  ;;  %v2256_v18 = vpop.permute.xlu1 %679 }
 0x118   :  { %v401_v0 = vmul.f32 %v2139_v54, %v2231_v46  ;;  %v212_v26 = vmin.f32 %v208_v19, 127.0  ;;  %v445_v36 = vmul.f32 %v2147_v58, %v2231_v46  ;;  %v498_v43 = vmul.f32 %v2161_v1, %v2227_v25  ;;  %v2259_v48 = vpop.permute.xlu0 %677 }
 0x119   :  { %411 = vrot.lane.b32.xlu1 %v402_v7, %s1880_s13  ;;  %v217_v41 = vtrunc.f32 %v213_v37  ;;  %v497_v49 = vmul.f32 %v2163_v2, %v2231_v46  ;;  %3087 = vst [vmem:[#allocation23_spill] sm:$0xff] %v2259_v48  ;;  %v364_v50 = vadd.f32 %v2216_v35, %v353_v42  ;;  %v550_v47 = vmul.f32 %v2177_v9, %v2227_v25 }
 0x11a   :  { %409 = vrot.lane.b32.xlu0 %v401_v0, %s1880_s13  ;;  %v216_v40 = vtrunc.f32 %v212_v26  ;;  %v363_v7 = vadd.f32 %v2216_v35, %v352_v45  ;;  %v549_v51 = vmul.f32 %v2179_v11, %v2231_v46  ;;  %v602_v0 = vmul.f32 %v2193_v20, %v2227_v25 }
 0x11b   :  { %v1748_v19 = vround.rtne.f32 %v364_v50  ;;  %v2271_v37 = vpop.permute.xlu1 %683  ;;  %v601_v26 = vmul.f32 %v2195_v23, %v2231_v46 }
 0x11c   :  { %v222_v44 = vpack.c.f32.eXmY %v216_v40, %v217_v41, 312  ;;  %3088 = vst [vmem:[#allocation24_spill] sm:$0xff] %v2271_v37 }
 0x11d   :  { %455 = vrot.lane.b32.xlu1 %v446_v15, %s1880_s13  ;;  %v1747_v15 = vround.rtne.f32 %v363_v7  ;;  %v372_v42 = vmax.f32 %v1748_v19, -128.0 }
 0x11e   :  { %453 = vrot.lane.b32.xlu0 %v445_v36, %s1880_s13  ;;  %v2275_v36 = vpop.permute.xlu0 %681  ;;  %v226_v35 = vpack.c.b8 %v222_v44, %v218_v63 }
 0x11f   :  { %3089 = vst [vmem:[#allocation25_spill] sm:$0xff] %v2275_v36  ;;  %v371_v50 = vmax.f32 %v1747_v15, -128.0  ;;  %v2288_v63 = vpop.permute.xlu1 %695  ;;  %v376_v7 = vmin.f32 %v372_v42, 127.0  ;;  %v757_v42 = vmul.f32 %v2225_v39, %v2231_v46 }
 0x120   :  { %228 = vst [vmem:[#allocation8] sm:$0xff] %v226_v35  ;;  %v706_v44 = vmul.f32 %v2288_v63, %v2227_v25 }
 0x121   :  { %507 = vrot.lane.b32.xlu1 %v498_v43, %s1880_s13  ;;  %v2299_v15 = vmul.f32 0.03, %v376_v7 }
 0x122   :  { %505 = vrot.lane.b32.xlu0 %v497_v49, %s1880_s13  ;;  %v654_v49 = vmul.f32 %v2205_v30, %v2227_v25 }
 0x123   :  { %v604_v36 = vmul.f32 %v2197_v24, %v2299_v15 }
 0x125   :  { %559 = vrot.lane.b32.xlu1 %v550_v47, %s1880_s13  ;;  %v653_v47 = vmul.f32 %v2207_v31, %v2231_v46 }
 0x126   :  { %557 = vrot.lane.b32.xlu0 %v549_v51, %s1880_s13  ;;  %v2293_v51 = vpop.permute.xlu0 %693 }
 0x127   :  { %v705_v19 = vmul.f32 %v2293_v51, %v2231_v46 }
 0x129   :  { %611 = vrot.lane.b32.xlu1 %v602_v0, %s1880_s13  ;;  %v375_v0 = vmin.f32 %v371_v50, 127.0 }
 0x12a   :  { %609 = vrot.lane.b32.xlu0 %v601_v26, %s1880_s13  ;;  %v1625_v41 = vpop.f32.mrb[4].mxu0  ;;  %v1628_v40 = vpop.f32.mrb[4].mxu1  ;;  %v758_v26 = vmul.f32 %v2223_v8, %v2227_v25 }
 0x12b   :  { %v2279_v43 = vpop.f32.mrb[5].mxu0  ;;  %v2281_v45 = vpop.f32.mrb[5].mxu1  ;;  %v2303_v35 = vmul.f32 0.03, %v375_v0  ;;  %v1033_v7 = vmul.f32 0.0007, %v1625_v41 }
 0x12c   :  { %v1454_v0 = vld [vmem:[%s3044_s5] ss:$0 sm:$0xff] }
 0x12d   :  { %663 = vrot.lane.b32.xlu1 %v654_v49, %s1880_s13  ;;  %v404_v49 = vmul.f32 %v2141_v55, %v2299_v15  ;;  %v403_v50 = vmul.f32 %v2137_v53, %v2303_v35  ;;  %v551_v41 = vmul.f32 %v2183_v13, %v2303_v35  ;;  %v759_v37 = vmul.f32 %v2233_v52, %v2303_v35 }
 0x12e   :  { %661 = vrot.lane.b32.xlu0 %v653_v47, %s1880_s13  ;;  %v448_v47 = vmul.f32 %v2149_v59, %v2299_v15 }
 0x131   :  { %715 = vrot.lane.b32.xlu1 %v706_v44, %s1880_s13  ;;  %v447_v44 = vmul.f32 %v2151_v60, %v2303_v35 }
 0x132   :  { %713 = vrot.lane.b32.xlu0 %v705_v19, %s1880_s13  ;;  %v500_v19 = vmul.f32 %v2165_v3, %v2299_v15 }
 0x135   :  { %767 = vrot.lane.b32.xlu1 %v758_v26, %s1880_s13  ;;  %v499_v26 = vmul.f32 %v2167_v4, %v2303_v35 }
 0x136   :  { %765 = vrot.lane.b32.xlu0 %v757_v42, %s1880_s13  ;;  %v1044_v42 = vadd.f32 %v1454_v0, %v1033_v7 }
 0x139   :  { %415 = vrot.lane.b32.xlu1 %v404_v49, %s1880_s13  ;;  %v1035_v49 = vmul.f32 0.0007, %v1628_v40 }
 0x13a   :  { %413 = vrot.lane.b32.xlu0 %v403_v50, %s1880_s13  ;;  %v552_v50 = vmul.f32 %v2181_v12, %v2299_v15 }
 0x13d   :  { %459 = vrot.lane.b32.xlu1 %v448_v47, %s1880_s13  ;;  %v1754_v47 = vround.rtne.f32 %v1044_v42  ;;  %v2347_v42 = vpop.permute.xlu1 %699 }
 0x13e   :  { %457 = vrot.lane.b32.xlu0 %v447_v44, %s1880_s13  ;;  %v1046_v44 = vadd.f32 %v1454_v0, %v1035_v49  ;;  %v708_v49 = vmul.f32 %v2347_v42, %v2299_v15 }
 0x13f   :  { %v1052_v40 = vmax.f32 %v1754_v47, -128.0 }
 0x140   :  { %v1756_v7 = vround.rtne.f32 %v1046_v44 }
 0x141   :  { %511 = vrot.lane.b32.xlu1 %v500_v19, %s1880_s13  ;;  %v603_v19 = vmul.f32 %v2199_v27, %v2303_v35 }
 0x142   :  { %509 = vrot.lane.b32.xlu0 %v499_v26, %s1880_s13  ;;  %v656_v26 = vmul.f32 %v2209_v32, %v2299_v15  ;;  %v1054_v47 = vmax.f32 %v1756_v7, -128.0 }
 0x145   :  { %563 = vrot.lane.b32.xlu1 %v552_v50, %s1880_s13  ;;  %v655_v50 = vmul.f32 %v2211_v33, %v2303_v35 }
 0x146   :  { %561 = vrot.lane.b32.xlu0 %v551_v41, %s1880_s13  ;;  %v1056_v41 = vmin.f32 %v1052_v40, 127.0 }
 0x149   :  { %615 = vrot.lane.b32.xlu1 %v604_v36, %s1880_s13  ;;  %v2352_v36 = vpop.permute.xlu0 %697 }
 0x14a   :  { %613 = vrot.lane.b32.xlu0 %v603_v19, %s1880_s13  ;;  %v707_v44 = vmul.f32 %v2352_v36, %v2303_v35  ;;  %v2358_v19 = vmul.f32 0.03, %v1056_v41 }
 0x14c   :  { %v1096_v7 = vmul.f32 %v2358_v19, %v2145_v57  ;;  %v1068_v41 = vmul.f32 %v2358_v19, %v2143_v56  ;;  %v1152_v56 = vmul.f32 %v2358_v19, %v2177_v9  ;;  %v1208_v9 = vmul.f32 %v2358_v19, %v2205_v30 }
 0x14d   :  { %667 = vrot.lane.b32.xlu1 %v656_v26, %s1880_s13  ;;  %v1058_v26 = vmin.f32 %v1054_v47, 127.0 }
 0x14e   :  { %665 = vrot.lane.b32.xlu0 %v655_v50, %s1880_s13  ;;  %v760_v50 = vmul.f32 %v2229_v29, %v2299_v15 }
 0x14f   :  { %v2366_v40 = vmul.f32 0.03, %v1058_v26 }
 0x151   :  { %719 = vrot.lane.b32.xlu1 %v708_v49, %s1880_s13  ;;  %v1032_v49 = vmul.f32 0.0007, %v2279_v43  ;;  %v1098_v47 = vmul.f32 %v2366_v40, %v2149_v59  ;;  %v1070_v26 = vmul.f32 %v2366_v40, %v2141_v55  ;;  %v1154_v59 = vmul.f32 %v2366_v40, %v2181_v12 }
 0x152   :  { %717 = vrot.lane.b32.xlu0 %v707_v44, %s1880_s13  ;;  %v1210_v12 = vmul.f32 %v2366_v40, %v2209_v32  ;;  %v1266_v32 = vmul.f32 %v2366_v40, %v2229_v29  ;;  %v1238_v29 = vmul.f32 %v2366_v40, %v2347_v42 }
 0x153   :  { %v1043_v44 = vadd.f32 %v1454_v0, %v1032_v49  ;;  %v1180_v49 = vmul.f32 %v2358_v19, %v2193_v20  ;;  %v1264_v20 = vmul.f32 %v2358_v19, %v2223_v8  ;;  %v1236_v8 = vmul.f32 %v2358_v19, %v2288_v63 }
 0x155   :  { %771 = vrot.lane.b32.xlu1 %v760_v50, %s1880_s13  ;;  %v1753_v57 = vround.rtne.f32 %v1043_v44  ;;  %v1124_v50 = vmul.f32 %v2358_v19, %v2161_v1 }
 0x156   :  { %769 = vrot.lane.b32.xlu0 %v759_v37, %s1880_s13  ;;  %v1034_v37 = vmul.f32 0.0007, %v2281_v45 }
 0x157   :  { %v1051_v55 = vmax.f32 %v1753_v57, -128.0 }
 0x158   :  { %v1045_v43 = vadd.f32 %v1454_v0, %v1034_v37  ;;  %v2440_v37 = vpop.permute.xlu1 %731 }
 0x159   :  { %1105 = vrot.lane.b32.xlu1 %v1096_v7, %s1880_s13  ;;  %v1126_v7 = vmul.f32 %v2366_v40, %v2165_v3  ;;  %v1055_v1 = vmin.f32 %v1051_v55, 127.0 }
 0x15a   :  { %1077 = vrot.lane.b32.xlu0 %v1068_v41, %s1880_s13  ;;  %v1755_v45 = vround.rtne.f32 %v1045_v43  ;;  %v2468_v43 = vmul.f32 %v2231_v46, %v2018_v22 }
 0x15b   :  { %v2402_v3 = vmul.f32 0.03, %v1055_v1 }
 0x15c   :  { %v1053_v0 = vmax.f32 %v1755_v45, -128.0 }
 0x15d   :  { %1109 = vrot.lane.b32.xlu1 %v1098_v47, %s1880_s13  ;;  %v1182_v47 = vmul.f32 %v2366_v40, %v2197_v24  ;;  %v1095_v44 = vmul.f32 %v2402_v3, %v2147_v58  ;;  %v1151_v58 = vmul.f32 %v2402_v3, %v2179_v11  ;;  %v1067_v63 = vmul.f32 %v2402_v3, %v2139_v54  ;;  %v2450_v54 = vpop.permute.xlu1 %735 }
 0x15e   :  { %1081 = vrot.lane.b32.xlu0 %v1070_v26, %s1880_s13  ;;  %v1057_v41 = vmin.f32 %v1053_v0, 127.0  ;;  %v1207_v11 = vmul.f32 %v2402_v3, %v2207_v31  ;;  %v1123_v31 = vmul.f32 %v2402_v3, %v2163_v2  ;;  %v1263_v57 = vmul.f32 %v2402_v3, %v2225_v39 }
 0x15f   :  { %v1179_v55 = vmul.f32 %v2402_v3, %v2195_v23  ;;  %v1235_v45 = vmul.f32 %v2402_v3, %v2293_v51 }
 0x160   :  { %v2410_v30 = vmul.f32 0.03, %v1057_v41  ;;  %v425_v41 = vmul.f32 %v2231_v46, %v1979_v10 }
 0x161   :  { %1161 = vrot.lane.b32.xlu1 %v1152_v56, %s1880_s13 }
 0x162   :  { %1133 = vrot.lane.b32.xlu0 %v1124_v50, %s1880_s13  ;;  %v1097_v24 = vmul.f32 %v2410_v30, %v2151_v60  ;;  %v1153_v60 = vmul.f32 %v2410_v30, %v2183_v13  ;;  %v1069_v42 = vmul.f32 %v2410_v30, %v2137_v53  ;;  %v2444_v13 = vpop.permute.xlu0 %729  ;;  %v1209_v26 = vmul.f32 %v2410_v30, %v2211_v33 }
 0x163   :  { %v2462_v53 = vmul.f32 %v2227_v25, %v2013_v21  ;;  %v1125_v2 = vmul.f32 %v2410_v30, %v2167_v4  ;;  %v1181_v23 = vmul.f32 %v2410_v30, %v2199_v27  ;;  %v1237_v0 = vmul.f32 %v2410_v30, %v2352_v36 }
 0x164   :  { %v534_v36 = vmul.f32 %v2169_v5, %v2227_v25 }
 0x165   :  { %1165 = vrot.lane.b32.xlu1 %v1154_v59, %s1880_s13  ;;  %v1265_v59 = vmul.f32 %v2410_v30, %v2233_v52  ;;  %v2490_v52 = vmul.f32 %v2153_v61, %v2227_v25 }
 0x166   :  { %1137 = vrot.lane.b32.xlu0 %v1126_v7, %s1880_s13  ;;  %v2454_v56 = vpop.permute.xlu0 %733 }
 0x169   :  { %1217 = vrot.lane.b32.xlu1 %v1208_v9, %s1880_s13  ;;  %v2496_v9 = vmul.f32 %v2155_v62, %v2231_v46 }
 0x16a   :  { %1189 = vrot.lane.b32.xlu0 %v1180_v49, %s1880_s13  ;;  %v426_v49 = vmul.f32 %v2227_v25, %v1996_v16  ;;  %v533_v16 = vmul.f32 %v2171_v6, %v2231_v46 }
 0x16d   :  { %1221 = vrot.lane.b32.xlu1 %v1210_v12, %s1880_s13  ;;  %v3099_v12 = vld [vmem:[#allocation20_spill] sm:$0xff] }
 0x16e   :  { %1193 = vrot.lane.b32.xlu0 %v1182_v47, %s1880_s13 }
 0x171   :  { %1273 = vrot.lane.b32.xlu1 %v1264_v20, %s1880_s13 }
 0x172   :  { %1103 = vrot.lane.b32.xlu0 %v1095_v44, %s1880_s13 }
 0x175   :  { %1277 = vrot.lane.b32.xlu1 %v1266_v32, %s1880_s13  ;;  %v2522_v32 = vmul.f32 %v2185_v14, %v2227_v25 }
 0x176   :  { %1107 = vrot.lane.b32.xlu0 %v1097_v24, %s1880_s13 }
 0x179   :  { %1245 = vrot.lane.b32.xlu1 %v1236_v8, %s1880_s13  ;;  %v2528_v8 = vmul.f32 %v2187_v17, %v2231_v46 }
 0x17a   :  { %1159 = vrot.lane.b32.xlu0 %v1151_v58, %s1880_s13 }
 0x17d   :  { %1249 = vrot.lane.b32.xlu1 %v1238_v29, %s1880_s13 }
 0x17e   :  { %1163 = vrot.lane.b32.xlu0 %v1153_v60, %s1880_s13 }
 0x181   :  { %1075 = vrot.lane.b32.xlu1 %v1067_v63, %s1880_s13 }
 0x182   :  { %1215 = vrot.lane.b32.xlu0 %v1207_v11, %s1880_s13  ;;  %v638_v11 = vmul.f32 %v2201_v28, %v2227_v25 }
 0x185   :  { %1079 = vrot.lane.b32.xlu1 %v1069_v42, %s1880_s13 }
 0x186   :  { %1219 = vrot.lane.b32.xlu0 %v1209_v26, %s1880_s13  ;;  %v3090_v26 = vld [vmem:[#allocation22_spill] sm:$0xff] }
 0x189   :  { %1131 = vrot.lane.b32.xlu1 %v1123_v31, %s1880_s13  ;;  %v637_v31 = vmul.f32 %v3090_v26, %v2231_v46 }
 0x18a   :  { %1271 = vrot.lane.b32.xlu0 %v1263_v57, %s1880_s13 }
 0x18b   :  { %v2464_v33 = vpop.permute.xlu1 %411 }
 0x18c   :  { %v2474_v50 = vpop.permute.xlu0 %409 }
 0x18d   :  { %1135 = vrot.lane.b32.xlu1 %v1125_v2, %s1880_s13 }
 0x18e   :  { %1275 = vrot.lane.b32.xlu0 %v1265_v59, %s1880_s13 }
 0x18f   :  { %v456_v22 = vpop.permute.xlu1 %455 }
 0x190   :  { %v454_v4 = vpop.permute.xlu0 %453  ;;  %v466_v27 = vadd.f32 %v456_v22, %v426_v49  ;;  %v2545_v22 = vmul.f32 %v2256_v18, %v2227_v25  ;;  %v742_v49 = vmul.f32 %v2440_v37, %v2227_v25  ;;  %v2617_v25 = vmul.f32 %v3099_v12, %v2299_v15 }
 0x191   :  { %1187 = vrot.lane.b32.xlu1 %v1179_v55, %s1880_s13  ;;  %v465_v20 = vadd.f32 %v454_v4, %v425_v41  ;;  %v2552_v4 = vmul.f32 %v2259_v48, %v2231_v46 }
 0x192   :  { %1243 = vrot.lane.b32.xlu0 %v1235_v45, %s1880_s13 }
 0x193   :  { %v2492_v7 = vpop.permute.xlu1 %507 }
 0x194   :  { %v2502_v1 = vpop.permute.xlu0 %505 }
 0x195   :  { %1191 = vrot.lane.b32.xlu1 %v1181_v23, %s1880_s13 }
 0x196   :  { %1247 = vrot.lane.b32.xlu0 %v1237_v0, %s1880_s13  ;;  %v3098_v0 = vld [vmem:[#allocation18_spill] sm:$0xff]  ;;  %s1884_s13 = smov [#allocation5]  }
 0x197   :  { %v560_v47 = vpop.permute.xlu1 %559  ;;  %v535_v45 = vmul.f32 %v3098_v0, %v2303_v35  ;;  %s1416_s14 = sshll.u32 %s1884_s13, 4  ;;  %s2991_s14 = int_to_ptr.vmem [resolvable:$true] %s1416_s14 }
 0x198   :  { %v558_v44 = vpop.permute.xlu0 %557  ;;  %v570_v10 = vadd.f32 %v560_v47, %v534_v36  ;;  %v3091_v36 = vld [vmem:[#allocation13_spill] sm:$0xff] }
 0x199   :  { %787 = vrot.lane.b32.xlu1 %v466_v27, %s1875_s21  ;;  %v569_v58 = vadd.f32 %v558_v44, %v533_v16  ;;  %v741_v27 = vmul.f32 %v2444_v13, %v2231_v46  ;;  %v2568_v16 = vmul.f32 %v2299_v15, %v3091_v36  ;;  %3100 = vst [vmem:[#allocation13_spill] sm:$0xff] %v2617_v25 }
 0x19a   :  { %785 = vrot.lane.b32.xlu0 %v465_v20, %s1875_s21 }
 0x19b   :  { %v2524_v24 = vpop.permute.xlu1 %611 }
 0x19c   :  { %v2532_v60 = vpop.permute.xlu0 %609 }
 0x19d   :  { %803 = vrot.lane.b32.xlu1 %v570_v10, %s1875_s21 }
 0x19e   :  { %801 = vrot.lane.b32.xlu0 %v569_v58, %s1875_s21  ;;  %v3092_v58 = vld [vmem:[#allocation14_spill] sm:$0xff] }
 0x19f   :  { %v664_v42 = vpop.permute.xlu1 %663 }
 0x1a0   :  { %v674_v57 = vadd.f32 %v664_v42, %v638_v11  ;;  %v662_v2 = vpop.permute.xlu0 %661  ;;  %v2575_v11 = vmul.f32 %v2303_v35, %v3092_v58 }
 0x1a1   :  { %v673_v59 = vadd.f32 %v662_v2, %v637_v31  ;;  %v3093_v31 = vld [vmem:[#allocation12_spill] sm:$0xff] }
 0x1a2   :  { %819 = vrot.lane.b32.xlu1 %v674_v57, %s1875_s21  ;;  %v428_v57 = vmul.f32 %v2299_v15, %v3093_v31  ;;  %v3095_v31 = vld [vmem:[#allocation16_spill] sm:$0xff] }
 0x1a3   :  { %v2547_v55 = vpop.permute.xlu1 %715  ;;  %817 = vrot.lane.b32.xlu0 %v673_v59, %s1875_s21  ;;  %v2588_v59 = vld [vmem:[%s3047_s8 + $0x10] sm:$0xff]  ;;  %v2602_v42 = vmul.f32 %v3095_v31, %v2303_v35 }
 0x1a4   :  { %v2556_v23 = vpop.permute.xlu0 %713 }
 0x1a7   :  { %v768_v41 = vpop.permute.xlu1 %767 }
 0x1a8   :  { %v2564_v47 = vadd.f32 %v768_v41, %v742_v49  ;;  %v766_v20 = vpop.permute.xlu0 %765  ;;  %v427_v49 = vmul.f32 %v2588_v59, %v2303_v35 }
 0x1a9   :  { %v777_v44 = vadd.f32 %v766_v20, %v741_v27 }
 0x1ab   :  { %v2570_v10 = vpop.permute.xlu1 %415  ;;  %833 = vrot.lane.b32.xlu0 %v777_v44, %s1875_s21  ;;  %v3094_v44 = vld [vmem:[#allocation15_spill] sm:$0xff] }
 0x1ac   :  { %v2579_v46 = vpop.permute.xlu0 %413  ;;  %v2595_v36 = vmul.f32 %v3094_v44, %v2299_v15 }
 0x1af   :  { %v460_v2 = vpop.permute.xlu1 %459 }
 0x1b0   :  { %v468_v41 = vadd.f32 %v460_v2, %v428_v57  ;;  %v458_v27 = vpop.permute.xlu0 %457  ;;  %v3102_v2 = vld [vmem:[#allocation21_spill] sm:$0xff] }
 0x1b1   :  { %v467_v20 = vadd.f32 %v458_v27, %v427_v49  ;;  %v3097_v49 = vld [vmem:[#allocation17_spill] sm:$0xff]  ;;  %v2624_v21 = vmul.f32 %v3102_v2, %v2303_v35  ;;  %v3105_v2 = vld [vmem:[#allocation24_spill] sm:$0xff] }
 0x1b2   :  { %791 = vrot.lane.b32.xlu1 %v468_v41, %s1875_s21  ;;  %v536_v41 = vmul.f32 %v3097_v49, %v2299_v15  ;;  %v2639_v39 = vmul.f32 %v3105_v2, %v2299_v15 }
 0x1b3   :  { %v2597_v58 = vpop.permute.xlu1 %511  ;;  %789 = vrot.lane.b32.xlu0 %v467_v20, %s1875_s21  ;;  %3103 = vst [vmem:[#allocation12_spill] sm:$0xff] %v2624_v21  ;;  %v1774_v21 = vld [vmem:[%s3046_s7 + $0x8] sm:$0xff] }
 0x1b4   :  { %v2606_v57 = vpop.permute.xlu0 %509  ;;  %3106 = vst [vmem:[#allocation17_spill] sm:$0xff] %v2639_v39 }
 0x1b5   :  { %3096 = vst [vmem:[#allocation22_spill] sm:$0xff] %v2606_v57 }
 0x1b7   :  { %v564_v27 = vpop.permute.xlu1 %563 }
 0x1b8   :  { %v572_v20 = vadd.f32 %v564_v27, %v536_v41  ;;  %v562_v63 = vpop.permute.xlu0 %561 }
 0x1b9   :  { %v571_v29 = vadd.f32 %v562_v63, %v535_v45  ;;  %v640_v45 = vmul.f32 %v2243_v34, %v2299_v15  ;;  %v3108_v63 = vld [vmem:[#allocation25_spill] sm:$0xff] }
 0x1ba   :  { %807 = vrot.lane.b32.xlu1 %v572_v20, %s1875_s21  ;;  %v639_v20 = vmul.f32 %v2247_v38, %v2303_v35 }
 0x1bb   :  { %v2619_v51 = vpop.permute.xlu1 %615  ;;  %805 = vrot.lane.b32.xlu0 %v571_v29, %s1875_s21 }
 0x1bc   :  { %3101 = vst [vmem:[#allocation14_spill] sm:$0xff] %v2619_v51  ;;  %v2628_v41 = vpop.permute.xlu0 %613 }
 0x1bd   :  { %3104 = vst [vmem:[#allocation15_spill] sm:$0xff] %v2628_v41  ;;  %v2646_v41 = vmul.f32 %v3108_v63, %v2303_v35 }
 0x1bf   :  { %v668_v27 = vpop.permute.xlu1 %667  ;;  %3109 = vst [vmem:[#allocation20_spill] sm:$0xff] %v2646_v41 }
 0x1c0   :  { %v676_v29 = vadd.f32 %v668_v27, %v640_v45  ;;  %v666_v48 = vpop.permute.xlu0 %665 }
 0x1c1   :  { %v675_v17 = vadd.f32 %v666_v48, %v639_v20 }
 0x1c2   :  { %823 = vrot.lane.b32.xlu1 %v676_v29, %s1875_s21 }
 0x1c3   :  { %v2641_v31 = vpop.permute.xlu1 %719  ;;  %821 = vrot.lane.b32.xlu0 %v675_v17, %s1875_s21  ;;  %v1773_v17 = vld [vmem:[%s3047_s8 + $0x8] sm:$0xff] }
 0x1c4   :  { %3107 = vst [vmem:[#allocation18_spill] sm:$0xff] %v2641_v31  ;;  %v2650_v45 = vpop.permute.xlu0 %717  ;;  %v1092_v29 = vmul.f32 %v1773_v17, %v2358_v19  ;;  %v2666_v31 = vmul.f32 %v1774_v21, %v2358_v19  ;;  %v1775_v17 = vld [vmem:[%s3047_s8 + $0x18] sm:$0xff] }
 0x1c5   :  { %3110 = vst [vmem:[#allocation24_spill] sm:$0xff] %v2650_v45  ;;  %v1094_v41 = vmul.f32 %v1775_v17, %v2366_v40  ;;  %v1776_v21 = vld [vmem:[%s3046_s7 + $0x18] sm:$0xff]  ;;  %v1148_v45 = vmul.f32 %v2358_v19, %v2169_v5  ;;  %v2703_v5 = vmul.f32 %v2366_v40, %v3094_v44 }
 0x1c6   :  { %3111 = vst [vmem:[#allocation26_spill] sm:$0xff] %v2666_v31 }
 0x1c7   :  { %v2654_v27 = vpop.permute.xlu1 %771 }
 0x1c8   :  { %v2656_v20 = vpop.permute.xlu0 %769 }
 0x1cb   :  { %v1106_v63 = vpop.permute.xlu1 %1105 }
 0x1cc   :  { %v1116_v39 = vadd.f32 %v1106_v63, %v1092_v29  ;;  %v2668_v48 = vpop.permute.xlu0 %1077  ;;  %v2681_v63 = vmul.f32 %v1776_v21, %v2366_v40 }
 0x1cd   :  { %3112 = vst [vmem:[#allocation27_spill] sm:$0xff] %v2668_v48  ;;  %v2692_v48 = vmul.f32 %v2358_v19, %v2153_v61 }
 0x1ce   :  { %1293 = vrot.lane.b32.xlu0 %v1116_v39, %s1875_s21 }
 0x1cf   :  { %v1110_v51 = vpop.permute.xlu1 %1109 }
 0x1d0   :  { %v1118_v29 = vadd.f32 %v1110_v51, %v1094_v41  ;;  %v2683_v25 = vpop.permute.xlu0 %1081  ;;  %v1150_v41 = vmul.f32 %v2366_v40, %v3097_v49  ;;  %v2714_v49 = vmul.f32 %v2358_v19, %v2185_v14  ;;  %v1777_v14 = vld [vmem:[%s3047_s8] sm:$0xff] }
 0x1d2   :  { %1297 = vrot.lane.b32.xlu0 %v1118_v29, %s1875_s21 }
 0x1d3   :  { %v1162_v17 = vpop.permute.xlu1 %1161 }
 0x1d4   :  { %v1172_v31 = vadd.f32 %v1162_v17, %v1148_v45  ;;  %v2694_v57 = vpop.permute.xlu0 %1133  ;;  %v1204_v45 = vmul.f32 %v2358_v19, %v2201_v28  ;;  %v2725_v28 = vmul.f32 %v2366_v40, %v3099_v12 }
 0x1d6   :  { %1309 = vrot.lane.b32.xlu0 %v1172_v31, %s1875_s21 }
 0x1d7   :  { %v1166_v21 = vpop.permute.xlu1 %1165 }
 0x1d8   :  { %v1174_v29 = vadd.f32 %v1166_v21, %v1150_v41  ;;  %v2705_v39 = vpop.permute.xlu0 %1137  ;;  %v1206_v41 = vmul.f32 %v2366_v40, %v2243_v34  ;;  %v1262_v34 = vmul.f32 %v2366_v40, %v2450_v54 }
 0x1da   :  { %1313 = vrot.lane.b32.xlu0 %v1174_v29, %s1875_s21 }
 0x1db   :  { %v1218_v31 = vpop.permute.xlu1 %1217 }
 0x1dc   :  { %v1228_v17 = vadd.f32 %v1218_v31, %v1204_v45  ;;  %v2716_v51 = vpop.permute.xlu0 %1189  ;;  %v1260_v45 = vmul.f32 %v2358_v19, %v2440_v37  ;;  %v2744_v37 = vmul.f32 %v2358_v19, %v2256_v18 }
 0x1de   :  { %1325 = vrot.lane.b32.xlu1 %v1228_v17, %s1875_s21 }
 0x1df   :  { %v1222_v21 = vpop.permute.xlu1 %1221 }
 0x1e0   :  { %v1230_v29 = vadd.f32 %v1222_v21, %v1206_v41  ;;  %v2727_v61 = vpop.permute.xlu0 %1193 }
 0x1e2   :  { %1329 = vrot.lane.b32.xlu1 %v1230_v29, %s1875_s21  ;;  %v1091_v29 = vmul.f32 %v1777_v14, %v2402_v3  ;;  %v2755_v14 = vmul.f32 %v2366_v40, %v3105_v2  ;;  %v1203_v2 = vmul.f32 %v2402_v3, %v3090_v26 }
 0x1e3   :  { %v1274_v31 = vpop.permute.xlu1 %1273 }
 0x1e4   :  { %v1284_v17 = vadd.f32 %v1274_v31, %v1260_v45  ;;  %v1104_v44 = vpop.permute.xlu0 %1103 }
 0x1e5   :  { %v1115_v31 = vadd.f32 %v1104_v44, %v1091_v29  ;;  %v1147_v29 = vmul.f32 %v2402_v3, %v2171_v6 }
 0x1e6   :  { %1341 = vrot.lane.b32.xlu1 %v1284_v17, %s1875_s21 }
 0x1e7   :  { %v1278_v12 = vpop.permute.xlu1 %1277 }
 0x1e8   :  { %v1286_v41 = vadd.f32 %v1278_v12, %v1262_v34  ;;  %v1108_v21 = vpop.permute.xlu0 %1107  ;;  %v1093_v12 = vmul.f32 %v2588_v59, %v2410_v30  ;;  %v1778_v59 = vld [vmem:[%s3046_s7] sm:$0xff] }
 0x1ea   :  { %1345 = vrot.lane.b32.xlu1 %v1286_v41, %s1875_s21  ;;  %v1117_v18 = vadd.f32 %v1108_v21, %v1093_v12 }
 0x1eb   :  { %v2746_v45 = vpop.permute.xlu1 %1245 }
 0x1ec   :  { %v1160_v34 = vpop.permute.xlu0 %1159 }
 0x1ed   :  { %v1171_v21 = vadd.f32 %v1160_v34, %v1147_v29  ;;  %v1205_v34 = vmul.f32 %v2410_v30, %v2247_v38 }
 0x1ee   :  { %1291 = vrot.lane.b32.xlu1 %v1115_v31, %s1875_s21  ;;  %v2768_v31 = vmul.f32 %v1778_v59, %v2402_v3  ;;  %v1779_v59 = vld [vmem:[%s3046_s7 + $0x10] sm:$0xff]  ;;  %s1882_s7 = smov [#allocation6]  }
 0x1ef   :  { %v2757_v41 = vpop.permute.xlu1 %1249  ;;  %v2783_v17 = vmul.f32 %v1779_v59, %v2410_v30  ;;  %v1259_v59 = vmul.f32 %v2402_v3, %v2444_v13 }
 0x1f0   :  { %v1164_v44 = vpop.permute.xlu0 %1163 }
 0x1f2   :  { %1295 = vrot.lane.b32.xlu1 %v1117_v18, %s1875_s21  ;;  %v1149_v18 = vmul.f32 %v2410_v30, %v3098_v0 }
 0x1f3   :  { %v2770_v40 = vpop.permute.xlu1 %1075 }
 0x1f4   :  { %v1087_v12 = vsub.f32 %v2768_v31, %v2770_v40  ;;  %v1216_v19 = vpop.permute.xlu0 %1215  ;;  %v3149_v31 = vld [vmem:[#allocation19_spill] sm:$0xff] }
 0x1f5   :  { %v1227_v6 = vadd.f32 %v1216_v19, %v1203_v2  ;;  %v1173_v19 = vadd.f32 %v1164_v44, %v1149_v18  ;;  %v1175_v40 = vmul.f32 %v2402_v3, %v3149_v31 }
 0x1f6   :  { %1307 = vrot.lane.b32.xlu1 %v1171_v21, %s1875_s21  ;;  %v2795_v21 = vmul.f32 %v2402_v3, %v2155_v62  ;;  %v1261_v62 = vmul.f32 %v2410_v30, %v2454_v56 }
 0x1f7   :  { %1323 = vrot.lane.b32.xlu0 %v1227_v6, %s1875_s21  ;;  %v2786_v26 = vpop.permute.xlu1 %1079 }
 0x1f8   :  { %v1089_v0 = vsub.f32 %v2783_v17, %v2786_v26  ;;  %v1220_v29 = vpop.permute.xlu0 %1219 }
 0x1f9   :  { %v1229_v2 = vadd.f32 %v1220_v29, %v1205_v34  ;;  %v744_v34 = vmul.f32 %v2450_v54, %v2299_v15 }
 0x1fa   :  { %1311 = vrot.lane.b32.xlu1 %v1173_v19, %s1875_s21 }
 0x1fb   :  { %1327 = vrot.lane.b32.xlu0 %v1229_v2, %s1875_s21  ;;  %v2798_v6 = vpop.permute.xlu1 %1131  ;;  %v780_v13 = vadd.f32 %v2654_v27, %v744_v34 }
 0x1fc   :  { %v1143_v38 = vsub.f32 %v2795_v21, %v2798_v6  ;;  %v1272_v44 = vpop.permute.xlu0 %1271 }
 0x1fd   :  { %v1283_v18 = vadd.f32 %v1272_v44, %v1259_v59  ;;  %v743_v59 = vmul.f32 %v2454_v56, %v2303_v35  ;;  %v3113_v35 = vsub.f32 %v2462_v53, %v2464_v33 }
 0x1fe   :  { %835 = vrot.lane.b32.xlu1 %v2564_v47, %s1875_s21 }
 0x1ff   :  { %1339 = vrot.lane.b32.xlu0 %v1283_v18, %s1875_s21  ;;  %v2811_v19 = vpop.permute.xlu1 %1135  ;;  %v779_v47 = vadd.f32 %v2656_v20, %v743_v59 }
 0x200   :  { %v1276_v29 = vpop.permute.xlu0 %1275 }
 0x201   :  { %v1285_v2 = vadd.f32 %v1276_v29, %v1261_v62  ;;  %v3114_v62 = vsub.f32 %v2468_v43, %v2474_v50  ;;  %v3117_v50 = vsub.f32 %v2522_v32, %v2524_v24  ;;  %v3120_v24 = vsub.f32 %v2552_v4, %v2556_v23  ;;  %v3124_v23 = vld [vmem:[#allocation22_spill] sm:$0xff] }
 0x202   :  { %839 = vrot.lane.b32.xlu1 %v780_v13, %s1875_s21  ;;  %v3115_v13 = vsub.f32 %v2490_v52, %v2492_v7  ;;  %v3118_v7 = vsub.f32 %v2528_v8, %v2532_v60 }
 0x203   :  { %1343 = vrot.lane.b32.xlu0 %v1285_v2, %s1875_s21  ;;  %v2818_v15 = vpop.permute.xlu1 %1187  ;;  %v3116_v2 = vsub.f32 %v2496_v9, %v2502_v1 }
 0x204   :  { %v2820_v54 = vpop.permute.xlu0 %1243  ;;  %v1199_v6 = vsub.f32 %v1175_v40, %v2818_v15 }
 0x207   :  { %837 = vrot.lane.b32.xlu0 %v779_v47, %s1875_s21  ;;  %v2824_v44 = vpop.permute.xlu1 %1191  ;;  %s1426_s21 = sshll.u32 %s1882_s7, 4  ;;  %s1427_s21 = int_to_ptr.vmem [resolvable:$true] %s1426_s21 }
 0x208   :  { %v2826_v27 = vpop.permute.xlu0 %1247  ;;  %s1802_s15 = scalar_lea.vmem %s1427_s21, 128  ;;  %p1807_p9 = scmp.lt.s32.totalorder %s1427_s21, %s1427_s21 }
 0x209   :  { %p1803_p8 = scmp.ne.s32.totalorder %s1427_s21, %s1802_s15  ;;  %p1808_p10 = scmp.lt.s32.totalorder %s1802_s15, %s1802_s15 }
 0x20b   :  { %v788_v18 = vpop.permute.xlu1 %787  ;;  %p1809_p11 = por %p1808_p10, %p1807_p9 }
 0x20c   :  { %v847_v56 = vsel %vm845_vm0, %v3113_v35, %v788_v18  ;;  %v786_v34 = vpop.permute.xlu0 %785 }
 0x20d   :  { %v846_v20 = vsel %vm845_vm0, %v3114_v62, %v786_v34  ;;  %v852_v29 = vsel %vm850_vm1, %v847_v56, %v3115_v13  ;;  %v3119_v34 = vsub.f32 %v2545_v22, %v2547_v55  ;;  %v3123_v55 = vsub.f32 %v2595_v36, %v2597_v58  ;;  %v3130_v36 = vld [vmem:[#allocation15_spill] sm:$0xff]  ;;  %p1810_p12 = pnand %p1809_p11, %p1803_p8 }
 0x20e   :  { %v851_v59 = vsel %vm850_vm1, %v846_v20, %v3116_v2  ;;  %v3121_v20 = vsub.f32 %v2568_v16, %v2570_v10  ;;  %v3122_v2 = vsub.f32 %v2575_v11, %v2579_v46  ;;  %v3127_v11 = vld [vmem:[#allocation14_spill] sm:$0xff] }
 0x20f   :  { %v804_v53 = vpop.permute.xlu1 %803 }
 0x210   :  { %v857_v33 = vsel %vm855_vm2, %v852_v29, %v804_v53  ;;  %v802_v47 = vpop.permute.xlu0 %801 }
 0x211   :  { %v856_v43 = vsel %vm855_vm2, %v851_v59, %v802_v47  ;;  %v862_v52 = vsel %vm860_vm3, %v857_v33, %v3117_v50  ;;  %v3125_v59 = vsub.f32 %v2602_v42, %v3124_v23 }
 0x212   :  { %v861_v9 = vsel %vm860_vm3, %v856_v43, %v3118_v7  ;;  %v3126_v43 = vld [vmem:[#allocation13_spill] sm:$0xff] }
 0x213   :  { %v3128_v46 = vsub.f32 %v3126_v43, %v3127_v11 }
 0x214   :  { %v820_v1 = vpop.permute.xlu1 %819 }
 0x215   :  { %v867_v18 = vsel %vm865_vm4, %v862_v52, %v820_v1  ;;  %v818_v35 = vpop.permute.xlu0 %817  ;;  %v3129_v52 = vld [vmem:[#allocation12_spill] sm:$0xff] }
 0x216   :  { %v866_v56 = vsel %vm865_vm4, %v861_v9, %v818_v35  ;;  %v2860_v32 = vsel %vm870_vm5, %v867_v18, %v3119_v34  ;;  %v3131_v58 = vsub.f32 %v3129_v52, %v3130_v36  ;;  %v3132_v35 = vld [vmem:[#allocation17_spill] sm:$0xff] }
 0x217   :  { %v871_v8 = vsel %vm870_vm5, %v866_v56, %v3120_v24  ;;  %v3133_v56 = vld [vmem:[#allocation18_spill] sm:$0xff] }
 0x218   :  { %v3134_v34 = vsub.f32 %v3132_v35, %v3133_v56 }
 0x21d   :  { %v834_v60 = vpop.permute.xlu0 %833 }
 0x224   :  { %v792_v62 = vpop.permute.xlu1 %791 }
 0x225   :  { %v849_v13 = vsel %vm845_vm0, %v3121_v20, %v792_v62  ;;  %v790_v29 = vpop.permute.xlu0 %789  ;;  %v3135_v62 = vld [vmem:[#allocation20_spill] sm:$0xff] }
 0x226   :  { %v848_v22 = vsel %vm845_vm0, %v3122_v2, %v790_v29  ;;  %v854_v4 = vsel %vm850_vm1, %v849_v13, %v3123_v55  ;;  %v3136_v20 = vld [vmem:[#allocation24_spill] sm:$0xff]  ;;  %v3139_v55 = vld [vmem:[#allocation27_spill] sm:$0xff] }
 0x227   :  { %v853_v53 = vsel %vm850_vm1, %v848_v22, %v3125_v59  ;;  %v3137_v13 = vsub.f32 %v3135_v62, %v3136_v20  ;;  %v3138_v22 = vld [vmem:[#allocation26_spill] sm:$0xff]  ;;  %v3141_v59 = vsub.f32 %v2692_v48, %v2694_v57 }
 0x22c   :  { %v808_v33 = vpop.permute.xlu1 %807 }
 0x22d   :  { %v859_v16 = vsel %vm855_vm2, %v854_v4, %v808_v33  ;;  %v806_v10 = vpop.permute.xlu0 %805  ;;  %v3140_v4 = vsub.f32 %v3138_v22, %v3139_v55 }
 0x22e   :  { %v858_v47 = vsel %vm855_vm2, %v853_v53, %v806_v10  ;;  %v864_v50 = vsel %vm860_vm3, %v859_v16, %v3128_v46  ;;  %v3142_v16 = vsub.f32 %v2681_v63, %v2683_v25  ;;  %v3145_v25 = vsub.f32 %v2725_v28, %v2727_v61 }
 0x22f   :  { %v863_v7 = vsel %vm860_vm3, %v858_v47, %v3131_v58  ;;  %v3143_v47 = vsub.f32 %v2703_v5, %v2705_v39  ;;  %v3146_v5 = vsub.f32 %v2744_v37, %v2746_v45 }
 0x234   :  { %v824_v9 = vpop.permute.xlu1 %823 }
 0x235   :  { %v869_v42 = vsel %vm865_vm4, %v864_v50, %v824_v9  ;;  %v822_v1 = vpop.permute.xlu0 %821  ;;  %v3144_v50 = vsub.f32 %v2714_v49, %v2716_v51  ;;  %v3147_v49 = vsub.f32 %v2755_v14, %v2757_v41 }
 0x236   :  { %v868_v18 = vsel %vm865_vm4, %v863_v7, %v822_v1  ;;  %v2898_v24 = vsel %vm870_vm5, %v869_v42, %v3134_v34 }
 0x237   :  { %v2904_v29 = vsel %vm870_vm5, %v868_v18, %v3137_v13  ;;  %v3148_v18 = vld [vmem:[#allocation16_spill] sm:$0xff]  ;;  %v3151_v13 = vld [vmem:[#allocation21_spill] sm:$0xff] }
 0x238   :  { %v1121_v37 = vmul.f32 %v2410_v30, %v3148_v18 }
 0x23a   :  { %v1145_v14 = vsub.f32 %v1121_v37, %v2811_v19 }
 0x240   :  { %v1294_v2 = vpop.permute.xlu0 %1293 }
 0x241   :  { %v1352_v23 = vsel %vm845_vm0, %v3140_v4, %v1294_v2 }
 0x242   :  { %v1356_v53 = vsel %vm850_vm1, %v1352_v23, %v3141_v59 }
 0x244   :  { %v1298_v33 = vpop.permute.xlu0 %1297 }
 0x245   :  { %v1354_v10 = vsel %vm845_vm0, %v3142_v16, %v1298_v33 }
 0x246   :  { %v1358_v43 = vsel %vm850_vm1, %v1354_v10, %v3143_v47 }
 0x248   :  { %v1310_v11 = vpop.permute.xlu0 %1309 }
 0x249   :  { %v1360_v46 = vsel %vm855_vm2, %v1356_v53, %v1310_v11 }
 0x24a   :  { %v1364_v57 = vsel %vm860_vm3, %v1360_v46, %v3144_v50 }
 0x24c   :  { %v1314_v48 = vpop.permute.xlu0 %1313 }
 0x24d   :  { %v1362_v52 = vsel %vm855_vm2, %v1358_v43, %v1314_v48 }
 0x24e   :  { %v1366_v63 = vsel %vm860_vm3, %v1362_v52, %v3145_v25 }
 0x250   :  { %v1326_v36 = vpop.permute.xlu1 %1325 }
 0x251   :  { %v1368_v39 = vsel %vm865_vm4, %v1364_v57, %v1326_v36 }
 0x252   :  { %v1372_v58 = vsel %vm870_vm5, %v1368_v39, %v3146_v5 }
 0x254   :  { %v1330_v7 = vpop.permute.xlu1 %1329 }
 0x255   :  { %v1370_v51 = vsel %vm865_vm4, %v1366_v63, %v1330_v7 }
 0x256   :  { %v1374_v9 = vsel %vm870_vm5, %v1370_v51, %v3147_v49 }
 0x258   :  { %v1342_v42 = vpop.permute.xlu1 %1341 }
 0x259   :  { %v1376_v56 = vsel %vm875_vm6, %v1372_v58, %v1342_v42 }
 0x25a   :  { %v1380_v20 = vmul.f32 33.333332, %v1376_v56 }
 0x25c   :  { %v1346_v61 = vpop.permute.xlu1 %1345  ;;  %v1758_v53 = vround.rtne.f32 %v1380_v20 }
 0x25d   :  { %v1378_v2 = vsel %vm875_vm6, %v1374_v9, %v1346_v61 }
 0x25e   :  { %v1382_v10 = vmul.f32 33.333332, %v1378_v2 }
 0x260   :  { %v1292_v28 = vpop.permute.xlu1 %1291  ;;  %v1760_v48 = vround.rtne.f32 %v1382_v10 }
 0x261   :  { %v1351_v1 = vsel %vm845_vm0, %v1087_v12, %v1292_v28  ;;  %v876_v12 = vsel %vm875_vm6, %v871_v8, %v834_v60  ;;  %v1177_v8 = vmul.f32 %v2410_v30, %v3151_v13 }
 0x262   :  { %v1355_v45 = vsel %vm850_vm1, %v1351_v1, %v1143_v38  ;;  %v3150_v38 = vld [vmem:[#allocation23_spill] sm:$0xff]  ;;  %v880_v62 = vmul.f32 33.333332, %v876_v12  ;;  %v1390_v49 = vmax.f32 %v1760_v48, -128.0 }
 0x263   :  { %v1231_v19 = vmul.f32 %v2402_v3, %v3150_v38  ;;  %v1201_v22 = vsub.f32 %v1177_v8, %v2824_v44  ;;  %v3152_v3 = vld [vmem:[#allocation25_spill] sm:$0xff] }
 0x264   :  { %v1296_v41 = vpop.permute.xlu1 %1295  ;;  %v1233_v55 = vmul.f32 %v2410_v30, %v3152_v3  ;;  %v1749_v59 = vround.rtne.f32 %v880_v62  ;;  %v1388_v30 = vmax.f32 %v1758_v53, -128.0  ;;  %v1394_v31 = vmin.f32 %v1390_v49, 127.0 }
 0x265   :  { %v1353_v35 = vsel %vm845_vm0, %v1089_v0, %v1296_v41  ;;  %v1255_v0 = vsub.f32 %v1231_v19, %v2820_v54 }
 0x266   :  { %v1357_v21 = vsel %vm850_vm1, %v1353_v35, %v1145_v14  ;;  %v1257_v16 = vsub.f32 %v1233_v55, %v2826_v27  ;;  %v888_v46 = vmax.f32 %v1749_v59, -128.0  ;;  %v1392_v5 = vmin.f32 %v1388_v30, 127.0 }
 0x267   :  { %v1398_v20 = vtrunc.f32 %v1394_v31 }
 0x268   :  { %v1308_v34 = vpop.permute.xlu1 %1307  ;;  %v892_v39 = vmin.f32 %v888_v46, 127.0  ;;  %v1396_v35 = vtrunc.f32 %v1392_v5 }
 0x269   :  { %v1359_v17 = vsel %vm855_vm2, %v1355_v45, %v1308_v34  ;;  %v1324_v26 = vpop.permute.xlu0 %1323 }
 0x26a   :  { %v1363_v60 = vsel %vm860_vm3, %v1359_v17, %v1199_v6  ;;  %v896_v37 = vtrunc.f32 %v892_v39 }
 0x26b   :  { %v1367_v15 = vsel %vm865_vm4, %v1363_v60, %v1324_v26 }
 0x26c   :  { %v1312_v4 = vpop.permute.xlu1 %1311  ;;  %v1371_v23 = vsel %vm870_vm5, %v1367_v15, %v1255_v0 }
 0x26d   :  { %v1361_v54 = vsel %vm855_vm2, %v1357_v21, %v1312_v4  ;;  %v1328_v33 = vpop.permute.xlu0 %1327 }
 0x26e   :  { %v1365_v47 = vsel %vm860_vm3, %v1361_v54, %v1201_v22 }
 0x26f   :  { %v1369_v43 = vsel %vm865_vm4, %v1365_v47, %v1328_v33 }
 0x270   :  { %v836_v11 = vpop.permute.xlu1 %835  ;;  %v1373_v44 = vsel %vm870_vm5, %v1369_v43, %v1257_v16 }
 0x271   :  { %v877_v50 = vsel %vm875_vm6, %v2860_v32, %v836_v11  ;;  %v1340_v57 = vpop.permute.xlu0 %1339 }
 0x272   :  { %v881_v52 = vmul.f32 33.333332, %v877_v50  ;;  %v1375_v25 = vsel %vm875_vm6, %v1371_v23, %v1340_v57 }
 0x273   :  { %v1379_v63 = vmul.f32 33.333332, %v1375_v25 }
 0x274   :  { %v1750_v27 = vround.rtne.f32 %v881_v52  ;;  %v840_v36 = vpop.permute.xlu1 %839 }
 0x275   :  { %v1757_v58 = vround.rtne.f32 %v1379_v63  ;;  %v879_v7 = vsel %vm875_vm6, %v2898_v24, %v840_v36  ;;  %v1344_v51 = vpop.permute.xlu0 %1343 }
 0x276   :  { %v889_v9 = vmax.f32 %v1750_v27, -128.0  ;;  %v883_v42 = vmul.f32 33.333332, %v879_v7  ;;  %v1377_v32 = vsel %vm875_vm6, %v1373_v44, %v1344_v51 }
 0x277   :  { %v1387_v61 = vmax.f32 %v1757_v58, -128.0  ;;  %v1381_v28 = vmul.f32 33.333332, %v1377_v32 }
 0x278   :  { %v893_v1 = vmin.f32 %v889_v9, 127.0  ;;  %v1752_v18 = vround.rtne.f32 %v883_v42 }
 0x279   :  { %v1391_v45 = vmin.f32 %v1387_v61, 127.0  ;;  %v1759_v14 = vround.rtne.f32 %v1381_v28  ;;  %v838_v41 = vpop.permute.xlu0 %837 }
 0x27a   :  { %v897_v40 = vtrunc.f32 %v893_v1  ;;  %v878_v24 = vsel %vm875_vm6, %v2904_v29, %v838_v41  ;;  %v891_v56 = vmax.f32 %v1752_v18, -128.0 }
 0x27b   :  { %v1395_v12 = vtrunc.f32 %v1391_v45  ;;  %v1389_v21 = vmax.f32 %v1759_v14, -128.0  ;;  %v882_v6 = vmul.f32 33.333332, %v878_v24 }
 0x27c   :  { %v900_v38 = vpack.c.f32.eXmY %v896_v37, %v897_v40, 312  ;;  %v895_v17 = vmin.f32 %v891_v56, 127.0 }
 0x27d   :  { %v1393_v19 = vmin.f32 %v1389_v21, 127.0  ;;  %v1751_v34 = vround.rtne.f32 %v882_v6  ;;  %v1399_v62 = vpack.c.f32.eXmY %v1395_v12, %v1396_v35, 312 }
 0x27e   :  { %v899_v29 = vtrunc.f32 %v895_v17 }
 0x27f   :  { %v1397_v26 = vtrunc.f32 %v1393_v19  ;;  %v890_v0 = vmax.f32 %v1751_v34, -128.0 }
 0x281   :  { %v894_v13 = vmin.f32 %v890_v0, 127.0  ;;  %v1403_v8 = vpack.c.f32.eXmY %v1397_v26, %v1398_v20, 312 }
 0x283   :  { %v898_v60 = vtrunc.f32 %v894_v13  ;;  %v1407_v2 = vpack.c.b8 %v1403_v8, %v1399_v62 }
 0x285   :  { %1409 = vst [vmem:[#allocation6] sm:$0xff] %v1407_v2  ;;  %v904_v15 = vpack.c.f32.eXmY %v898_v60, %v899_v29, 312 }
 0x286   :  { %1813 = shalt.err (!%p1810_p12)
}
 0x287   :  { %s1814_s17 = scalar_lea.hbm %s3049_s10, 128 }
 0x288   :  { %p1815_p13 = scmp.ne.s32.totalorder %s3049_s10, %s1814_s17  ;;  %p1818_p0 = scmp.lt.u32.totalorder %s1814_s17, %s3049_s10 }
 0x28a   :  { %p1820_p1 = pnand %p1818_p0, %p1815_p13 }
 0x28c   :  { %1823 = shalt.err (!%p1820_p1)
}
 0x28d   :  { %1429 = dma.vmem_to_hbm [thread:$0]  %s1427_s21, 128, %s3049_s10, [#allocation7]   ;;  %v908_v22 = vpack.c.b8 %v904_v15, %v900_v38 }
 0x28e   :  { %s1824_s22 = scalar_lea.vmem %s2989_s12, 128  ;;  %p1829_p3 = scmp.lt.s32.totalorder %s2989_s12, %s2989_s12 }
 0x28f   :  { %p1825_p2 = scmp.ne.s32.totalorder %s2989_s12, %s1824_s22  ;;  %p1830_p4 = scmp.lt.s32.totalorder %s1824_s22, %s1824_s22 }
 0x291   :  { %p1831_p5 = por %p1830_p4, %p1829_p3 }
 0x293   :  { %p1832_p6 = pnand %p1831_p5, %p1825_p2 }
 0x295   :  { %1835 = shalt.err (!%p1832_p6)
}
 0x296   :  { %s1836_s3 = scalar_lea.hbm %s3050_s11, 128 }
 0x297   :  { %p1837_p7 = scmp.ne.s32.totalorder %s3050_s11, %s1836_s3  ;;  %p1840_p8 = scmp.lt.u32.totalorder %s1836_s3, %s3050_s11 }
 0x299   :  { %p1842_p9 = pnand %p1840_p8, %p1837_p7 }
 0x29b   :  { %1845 = shalt.err (!%p1842_p9)
}
 0x29c   :  { %1439 = dma.vmem_to_hbm [thread:$0]  %s2989_s12, 128, %s3050_s11, [#allocation7]   ;;  %910 = vst [vmem:[#allocation5] sm:$0xff] %v908_v22 }
 0x29d   :  { %s1846_s28 = scalar_lea.vmem %s2991_s14, 128  ;;  %p1851_p11 = scmp.lt.s32.totalorder %s2991_s14, %s2991_s14 }
 0x29e   :  { %p1847_p10 = scmp.ne.s32.totalorder %s2991_s14, %s1846_s28  ;;  %p1852_p12 = scmp.lt.s32.totalorder %s1846_s28, %s1846_s28 }
 0x2a0   :  { %p1853_p13 = por %p1852_p12, %p1851_p11 }
 0x2a2   :  { %p1854_p0 = pnand %p1853_p13, %p1847_p10 }
 0x2a4   :  { %1857 = shalt.err (!%p1854_p0)
}
 0x2a5   :  { %s1858_s7 = scalar_lea.hbm %s3048_s9, 128 }
 0x2a6   :  { %p1859_p1 = scmp.ne.s32.totalorder %s3048_s9, %s1858_s7  ;;  %p1862_p2 = scmp.lt.u32.totalorder %s1858_s7, %s3048_s9 }
 0x2a8   :  { %p1864_p3 = pnand %p1862_p2, %p1859_p1 }
 0x2aa   :  { %1867 = shalt.err (!%p1864_p3)
}
 0x2ab   :  { %1419 = dma.vmem_to_hbm [thread:$0]  %s2991_s14, 128, %s3048_s9, [#allocation4]  }
 0x2ac   :  { %1870 = dma.done.wait [#allocation4], 128  }
 0x2ad   :  { %1871 = vsyncadd [#allocation4], 4294967168 }
 0x2ae   :  { %1872 = dma.done.wait [#allocation7], 256  }
 0x2af   :  { %1873 = vsyncadd [#allocation7], 4294967040 }
 0x2b0   :  { %1449 = vsyncpa [#allocation3], 1 }
 0x2b1   :  { %1450 = vsyncpa [#allocation4], 1 }
 0x2b2   :  { %1451 = vsyncpa [#allocation7], 1 }

</bundles_post_ra>
